<compile_context>
chip_gen: v6e
topology: v6e:2x2x1
jax: 0.10.0
libtpu: 0.0.40
codegen_flags: <defaults>
</compile_context>

<pallas_src>
import functools

import jax
import jax.numpy as jnp
from jax.experimental import pallas as pl
from jax.experimental.pallas import tpu as pltpu


# ----------------------------------------------------------------------------
# Pallas kernels
# ----------------------------------------------------------------------------
def _matmul_bias_kernel(a_ref, b_ref, bias_ref, o_ref, *, apply_relu):
    """o = a @ b + bias (f32 accumulate / epilogue), optional ReLU."""
    acc = jnp.dot(a_ref[...], b_ref[...], preferred_element_type=jnp.float32)
    acc = acc + bias_ref[...]
    if apply_relu:
        acc = jnp.maximum(acc, 0.0)
    o_ref[...] = acc.astype(o_ref.dtype)


def matmul_bias(a, b, bias, *, relu=False):
    """Pallas matmul: a:(M,K) @ b:(K,N) + bias:(N,), bf16 MXU inputs, f32 out.

    Full-M block when M <= 512 (grid=1); otherwise tiles of 512 rows with
    zero padding on the tail (no divisibility requirement on M).
    """
    M, K = a.shape
    K2, N = b.shape
    assert K == K2
    MAX_TM = 512
    if M <= MAX_TM:
        tm, Mp = M, M
    else:
        tm = MAX_TM
        Mp = pl.cdiv(M, tm) * tm

    a_in = a.astype(jnp.bfloat16)
    if Mp != M:
        a_in = jnp.pad(a_in, ((0, Mp - M), (0, 0)))
    b_in = b.astype(jnp.bfloat16)
    bias_in = bias.reshape(1, N).astype(jnp.float32)

    out = pl.pallas_call(
        functools.partial(_matmul_bias_kernel, apply_relu=relu),
        out_shape=jax.ShapeDtypeStruct((Mp, N), jnp.float32),
        grid=(Mp // tm,),
        in_specs=[
            pl.BlockSpec((tm, K), lambda i: (i, 0)),
            pl.BlockSpec((K, N), lambda i: (0, 0)),
            pl.BlockSpec((1, N), lambda i: (0, 0)),
        ],
        out_specs=pl.BlockSpec((tm, N), lambda i: (i, 0)),
        compiler_params=pltpu.CompilerParams(dimension_semantics=("parallel",)),
    )(a_in, b_in, bias_in)
    return out[:M] if Mp != M else out


def _head_gumbel_kernel(x_ref, w_ref, b_ref, u_ref, logits_ref, sample_ref,
                        *, inv_temp):
    """Fused: logits = x @ W + b ; sample = softmax((logits + gumbel) * inv_T)."""
    logits = jnp.dot(x_ref[...], w_ref[...],
                     preferred_element_type=jnp.float32) + b_ref[...]
    logits_ref[...] = logits

    eps = jnp.finfo(jnp.float32).eps
    u = jnp.clip(u_ref[...], eps, 1.0 - eps)           # clamp_probs
    g = -jnp.log(-jnp.log(u))                          # Gumbel(0,1)
    s = (logits + g) * inv_temp
    m = jnp.max(s, axis=-1, keepdims=True)
    e = jnp.exp(s - m)
    denom = jnp.sum(e, axis=-1, keepdims=True)
    sample_ref[...] = e * pl.reciprocal(denom, approx=True)


def head_gumbel(x, w, b, uniforms, temperature):
    """Fused (proj∘head) Linear + RelaxedOneHotCategorical.rsample."""
    M, K = x.shape
    _, L = w.shape
    return pl.pallas_call(
        functools.partial(_head_gumbel_kernel, inv_temp=1.0 / float(temperature)),
        out_shape=(jax.ShapeDtypeStruct((M, L), jnp.float32),
                   jax.ShapeDtypeStruct((M, L), jnp.float32)),
        grid=(1,),
        in_specs=[
            pl.BlockSpec((M, K), lambda i: (0, 0)),
            pl.BlockSpec((K, L), lambda i: (0, 0)),
            pl.BlockSpec((1, L), lambda i: (0, 0)),
            pl.BlockSpec((M, L), lambda i: (0, 0)),
        ],
        out_specs=(pl.BlockSpec((M, L), lambda i: (0, 0)),
                   pl.BlockSpec((M, L), lambda i: (0, 0))),
    )(x.astype(jnp.float32), w.astype(jnp.float32),
      b.reshape(1, L).astype(jnp.float32), uniforms.astype(jnp.float32))


# ----------------------------------------------------------------------------
# Conv glue (NHWC im2col in plain JAX; the matmul hot path is Pallas)
# ----------------------------------------------------------------------------
def conv2d_nhwc(x, wmat, bias, *, kh, kw, stride, padding, relu=False):
    """x: (B,H,W,C) NHWC; wmat: (kh*kw*C, O) with column order (kh,kw,c)."""
    B, H, W, C = x.shape
    O = wmat.shape[1]
    x_p = jnp.pad(x, ((0, 0), (padding, padding), (padding, padding), (0, 0)))
    Hout = (H + 2 * padding - kh) // stride + 1
    Wout = (W + 2 * padding - kw) // stride + 1
    patches = []
    for i in range(kh):
        for j in range(kw):
            patches.append(
                x_p[:, i:i + stride * Hout:stride, j:j + stride * Wout:stride, :])
    cols = jnp.stack(patches, axis=3).reshape(B * Hout * Wout, kh * kw * C)
    out = matmul_bias(cols, wmat, bias, relu=relu)        # (B*Hout*Wout, O)
    return out.reshape(B, Hout, Wout, O)


def conv_transpose2d_phase(x, wmat_fused, bias_fused, *, relu=False):
    """ConvTranspose2d(4,4,stride=2,pad=1) via sub-pixel phase decomposition.

    wmat_fused: (9*Cin, 4*Cout) built by `prepare_params`; one 3x3/pad-1
    im2col matmul produces all 4 output phases, then a pixel shuffle
    interleaves them into the 2x upsampled NHWC output.
    """
    B, H, W, _ = x.shape
    Cout = wmat_fused.shape[1] // 4
    out = conv2d_nhwc(x, wmat_fused, bias_fused, kh=3, kw=3, stride=1,
                      padding=1, relu=relu)               # (B,H,W,4*Cout)
    out = out.reshape(B, H, W, 2, 2, Cout)                # axes: (ph, pw)
    out = out.transpose(0, 1, 3, 2, 4, 5).reshape(B, 2 * H, 2 * W, Cout)
    return out


# ----------------------------------------------------------------------------
# Parameter init (PyTorch layouts) + conversion to matmul layouts
# ----------------------------------------------------------------------------
def init_params(key, in_ch, hidden, latent):
    ks = jax.random.split(key, 14)

    def conv_w(k, shape):
        fan_in = shape[1] * shape[2] * shape[3]
        return jax.random.normal(k, shape, jnp.float32) / jnp.sqrt(fan_in)

    def lin_w(k, shape):
        return jax.random.normal(k, shape, jnp.float32) / jnp.sqrt(shape[1])

    return {
        # VQVAEEncoder
        "enc1_w": conv_w(ks[0], (hidden, in_ch, 4, 4)),
        "enc1_b": 0.01 * jax.random.normal(ks[1], (hidden,), jnp.float32),
        "enc2_w": conv_w(ks[2], (hidden, hidden, 4, 4)),
        "enc2_b": 0.01 * jax.random.normal(ks[3], (hidden,), jnp.float32),
        # 1x1 projection to latent_dim
        "proj_w": conv_w(ks[4], (latent, hidden, 1, 1)),
        "proj_b": 0.01 * jax.random.normal(ks[5], (latent,), jnp.float32),
        # proposal_logits_head (nn.Linear, weight layout (out, in))
        "head_w": lin_w(ks[6], (latent, latent)),
        "head_b": 0.01 * jax.random.normal(ks[7], (latent,), jnp.float32),
        # generative_network: Conv2d(latent, hidden, 3, padding=1)
        "gen_w": conv_w(ks[8], (hidden, latent, 3, 3)),
        "gen_b": 0.01 * jax.random.normal(ks[9], (hidden,), jnp.float32),
        # VQVAEDecoder (transposed convs, weight layout (Cin, Cout, KH, KW))
        "dec1_w": conv_w(ks[10], (hidden, hidden, 4, 4)),
        "dec1_b": 0.01 * jax.random.normal(ks[11], (hidden,), jnp.float32),
        "dec2_w": conv_w(ks[12], (hidden, in_ch, 4, 4)),
        "dec2_b": 0.01 * jax.random.normal(ks[13], (in_ch,), jnp.float32),
    }


def prepare_params(params, in_ch, hidden, latent):
    """Convert PyTorch-layout params to matmul layouts (done once, host side)."""

    def conv_wmat(w):
        # (O,C,KH,KW) -> (KH*KW*C, O) matching the NHWC im2col column order.
        O, C, KH, KW = w.shape
        return jnp.transpose(w, (2, 3, 1, 0)).reshape(KH * KW * C, O)

    def convt_fused(w, b):
        # ConvTranspose2d(4,4,s=2,p=1), weight (Cin,Cout,4,4).
        # Phase ph output row 2a+ph reads input rows a+dh with kernel row kh:
        #   ph=0: (dh,kh) in {(0,1),(-1,3)} ; ph=1: {(0,2),(+1,0)}  (same for w).
        Cin, Cout, KH, KW = w.shape
        assert (KH, KW) == (4, 4)
        taps = {0: ((0, 1), (-1, 3)), 1: ((0, 2), (1, 0))}
        wf = jnp.zeros((3, 3, Cin, 2, 2, Cout), w.dtype)
        for ph in (0, 1):
            for pw in (0, 1):
                for dh, kh in taps[ph]:
                    for dw, kw in taps[pw]:
                        wf = wf.at[dh + 1, dw + 1, :, ph, pw, :].set(w[:, :, kh, kw])
        return wf.reshape(9 * Cin, 4 * Cout), jnp.tile(b, 4)

    # Fold the 1x1 proj conv into the Linear head (exact linear composition):
    #   logits = rows @ (Wp @ Wh^T) + (proj_b @ Wh^T + head_b)
    Wp = params["proj_w"].reshape(latent, hidden).T          # (hidden, latent)
    WhT = params["head_w"].T                                 # (latent_in, latent_out)
    head_wmat = Wp @ WhT                                     # (hidden, latent)
    head_b = params["proj_b"] @ WhT + params["head_b"]

    dec1_wmat, dec1_b = convt_fused(params["dec1_w"], params["dec1_b"])
    dec2_wmat, dec2_b = convt_fused(params["dec2_w"], params["dec2_b"])

    return {
        "enc1_wmat": conv_wmat(params["enc1_w"]), "enc1_b": params["enc1_b"],
        "enc2_wmat": conv_wmat(params["enc2_w"]), "enc2_b": params["enc2_b"],
        "head_wmat": head_wmat, "head_b": head_b,
        "gen_wmat": conv_wmat(params["gen_w"]), "gen_b": params["gen_b"],
        "dec1_wmat": dec1_wmat, "dec1_b": dec1_b,
        "dec2_wmat": dec2_wmat, "dec2_b": dec2_b,
    }


# ----------------------------------------------------------------------------
# Forward pass
# ----------------------------------------------------------------------------
def model_v2_forward(prep, x_nchw, uniforms, temperature):
    # NCHW (PyTorch interface) -> NHWC once at entry.
    x = jnp.transpose(x_nchw, (0, 2, 3, 1))

    # ---- proposal_network: VQVAEEncoder (proj folded into head) ----
    h = conv2d_nhwc(x, prep["enc1_wmat"], prep["enc1_b"],
                    kh=4, kw=4, stride=2, padding=1, relu=True)
    h = conv2d_nhwc(h, prep["enc2_wmat"], prep["enc2_b"],
                    kh=4, kw=4, stride=2, padding=1, relu=True)
    B, eh, ew, hidden = h.shape

    # NHWC rows are already in the (b, h, w)-major / channel-last order that
    # PyTorch's flatten(-2).transpose(-1,-2).flatten(end_dim=1) produces.
    rows = h.reshape(B * eh * ew, hidden)

    # ---- fused (proj+head) Linear + Gumbel-softmax rsample ----
    proposal_logits, proposal_sample_copy = head_gumbel(
        rows, prep["head_wmat"], prep["head_b"], uniforms, temperature)
    L = proposal_logits.shape[-1]

    # Reshape the sample back to NHWC spatial layout (no transpose needed).
    sample = proposal_sample_copy.reshape(B, eh, ew, L)

    # ---- generative_network: Conv3x3 + VQVAEDecoder (phase-decomposed) ----
    g = conv2d_nhwc(sample, prep["gen_wmat"], prep["gen_b"],
                    kh=3, kw=3, stride=1, padding=1, relu=False)
    g = conv_transpose2d_phase(g, prep["dec1_wmat"], prep["dec1_b"], relu=True)
    recon = conv_transpose2d_phase(g, prep["dec2_wmat"], prep["dec2_b"],
                                   relu=False)

    # Back to NCHW to match the PyTorch module's output layout.
    reconstruction = jnp.transpose(recon, (0, 3, 1, 2))

    # The distribution object is returned as its parameters (logits, temperature).
    return reconstruction, (proposal_logits, temperature), proposal_sample_copy


if __name__ == "__main__":
    IN_CH, HIDDEN, LATENT = 3, 32, 16
    B, H, W = 2, 16, 16
    TEMPERATURE = 0.5

    root = jax.random.PRNGKey(0)
    k_param, k_x, k_noise = jax.random.split(root, 3)

    params = init_params(k_param, IN_CH, HIDDEN, LATENT)
    prep = prepare_params(params, IN_CH, HIDDEN, LATENT)
    x = jax.random.normal(k_x, (B, IN_CH, H, W), jnp.float32)

    eh, ew = H // 4, W // 4           # two stride-2 convs in the encoder
    uniforms = jax.random.uniform(k_noise, (B * eh * ew, LATENT), jnp.float32)

    fwd = jax.jit(functools.partial(model_v2_forward, temperature=TEMPERATURE))
    recon, (logits, temp), sample_copy = fwd(prep, x, uniforms)
    jax.block_until_ready((recon, logits, sample_copy))

    assert recon.shape == (B, IN_CH, H, W)
    assert logits.shape == (B * eh * ew, LATENT)
    assert sample_copy.shape == (B * eh * ew, LATENT)
    assert bool(jnp.all(jnp.isfinite(recon)))
    # sample rows are on the simplex (loose tol: approx EUP reciprocal + bf16 MXU)
    assert bool(jnp.allclose(jnp.sum(sample_copy, axis=-1), 1.0, atol=1e-2))

    print("KERNEL_OK")
</pallas_src>

<mosaic_0001>
module attributes {stable_mosaic.version = 11 : i64} {
  func.func @_matmul_bias_kernel(%arg0: i32, %arg1: memref<128x48xbf16, #tpu.memory_space<vmem>>, %arg2: memref<48x32xbf16, #tpu.memory_space<vmem>>, %arg3: memref<1x32xf32, #tpu.memory_space<vmem>>, %arg4: memref<128x32xf32, #tpu.memory_space<vmem>>) attributes {dimension_semantics = [#tpu.dimension_semantics<parallel>], iteration_bounds = array<i64: 1>, scalar_prefetch = 0 : i64, scratch_operands = 0 : i64, tpu.core_type = #tpu.core_type<tc>, window_params = [{transform_indices = @transform_0, window_bounds = array<i64: 128, 48>}, {pipeline_mode = #tpu.pipeline_mode<synchronous>, transform_indices = @transform_1, window_bounds = array<i64: 48, 32>}, {pipeline_mode = #tpu.pipeline_mode<synchronous>, transform_indices = @transform_2, window_bounds = array<i64: 1, 32>}, {transform_indices = @transform_3, window_bounds = array<i64: 128, 32>}]} {
    %c0 = arith.constant 0 : index
    %c0_0 = arith.constant 0 : index
    %0 = vector.load %arg1[%c0, %c0_0] : memref<128x48xbf16, #tpu.memory_space<vmem>>, vector<128x48xbf16>
    %c0_1 = arith.constant 0 : index
    %c0_2 = arith.constant 0 : index
    %1 = vector.load %arg2[%c0_1, %c0_2] : memref<48x32xbf16, #tpu.memory_space<vmem>>, vector<48x32xbf16>
    %cst = arith.constant dense<0.000000e+00> : vector<128x32xf32>
    %2 = tpu.matmul %0, %1, %cst {dimension_numbers = #tpu.dot_dimension_numbers<[1], [0], [0], [1], [0, 0, 1, 1], [], []>} : vector<128x48xbf16>, vector<48x32xbf16>, vector<128x32xf32> -> vector<128x32xf32>
    %c0_3 = arith.constant 0 : index
    %c0_4 = arith.constant 0 : index
    %3 = vector.load %arg3[%c0_3, %c0_4] : memref<1x32xf32, #tpu.memory_space<vmem>>, vector<1x32xf32>
    %4 = vector.broadcast %3 : vector<1x32xf32> to vector<128x32xf32>
    %5 = arith.addf %2, %4 : vector<128x32xf32>
    %cst_5 = arith.constant 0.000000e+00 : f32
    %6 = vector.broadcast %cst_5 : f32 to vector<128x32xf32>
    %7 = arith.maximumf %5, %6 : vector<128x32xf32>
    %c0_6 = arith.constant 0 : index
    %c0_7 = arith.constant 0 : index
    %8 = vector.load %arg4[%c0_6, %c0_7] : memref<128x32xf32, #tpu.memory_space<vmem>>, vector<128x32xf32>
    tpu.vector_store %arg4[%c0_6, %c0_7], %7 {strides = array<i32>} : memref<128x32xf32, #tpu.memory_space<vmem>>, vector<128x32xf32>,
    return
  }
  func.func @transform_0(%arg0: i32) -> (i32, i32) {
    %c0_i32 = arith.constant 0 : i32
    %c0_i32_0 = arith.constant 0 : i32
    return %arg0, %c0_i32 : i32, i32
  }
  func.func @transform_1(%arg0: i32) -> (i32, i32) {
    %c0_i32 = arith.constant 0 : i32
    %c0_i32_0 = arith.constant 0 : i32
    %c0_i32_1 = arith.constant 0 : i32
    return %c0_i32, %c0_i32_0 : i32, i32
  }
  func.func @transform_2(%arg0: i32) -> (i32, i32) {
    %c0_i32 = arith.constant 0 : i32
    %c0_i32_0 = arith.constant 0 : i32
    %c0_i32_1 = arith.constant 0 : i32
    return %c0_i32, %c0_i32_0 : i32, i32
  }
  func.func @transform_3(%arg0: i32) -> (i32, i32) {
    %c0_i32 = arith.constant 0 : i32
    %c0_i32_0 = arith.constant 0 : i32
    return %arg0, %c0_i32 : i32, i32
  }
}

module attributes {stable_mosaic.version = 11 : i64} {
  func.func @_matmul_bias_kernel(%arg0: i32, %arg1: memref<32x512xbf16, #tpu.memory_space<vmem>>, %arg2: memref<512x32xbf16, #tpu.memory_space<vmem>>, %arg3: memref<1x32xf32, #tpu.memory_space<vmem>>, %arg4: memref<32x32xf32, #tpu.memory_space<vmem>>) attributes {dimension_semantics = [#tpu.dimension_semantics<parallel>], iteration_bounds = array<i64: 1>, scalar_prefetch = 0 : i64, scratch_operands = 0 : i64, tpu.core_type = #tpu.core_type<tc>, window_params = [{transform_indices = @transform_0, window_bounds = array<i64: 32, 512>}, {pipeline_mode = #tpu.pipeline_mode<synchronous>, transform_indices = @transform_1, window_bounds = array<i64: 512, 32>}, {pipeline_mode = #tpu.pipeline_mode<synchronous>, transform_indices = @transform_2, window_bounds = array<i64: 1, 32>}, {transform_indices = @transform_3, window_bounds = array<i64: 32, 32>}]} {
    %c0 = arith.constant 0 : index
    %c0_0 = arith.constant 0 : index
    %0 = vector.load %arg1[%c0, %c0_0] : memref<32x512xbf16, #tpu.memory_space<vmem>>, vector<32x512xbf16>
    %c0_1 = arith.constant 0 : index
    %c0_2 = arith.constant 0 : index
    %1 = vector.load %arg2[%c0_1, %c0_2] : memref<512x32xbf16, #tpu.memory_space<vmem>>, vector<512x32xbf16>
    %cst = arith.constant dense<0.000000e+00> : vector<32x32xf32>
    %2 = tpu.matmul %0, %1, %cst {dimension_numbers = #tpu.dot_dimension_numbers<[1], [0], [0], [1], [0, 0, 1, 1], [], []>} : vector<32x512xbf16>, vector<512x32xbf16>, vector<32x32xf32> -> vector<32x32xf32>
    %c0_3 = arith.constant 0 : index
    %c0_4 = arith.constant 0 : index
    %3 = vector.load %arg3[%c0_3, %c0_4] : memref<1x32xf32, #tpu.memory_space<vmem>>, vector<1x32xf32>
    %4 = vector.broadcast %3 : vector<1x32xf32> to vector<32x32xf32>
    %5 = arith.addf %2, %4 : vector<32x32xf32>
    %cst_5 = arith.constant 0.000000e+00 : f32
    %6 = vector.broadcast %cst_5 : f32 to vector<32x32xf32>
    %7 = arith.maximumf %5, %6 : vector<32x32xf32>
    %c0_6 = arith.constant 0 : index
    %c0_7 = arith.constant 0 : index
    %8 = vector.load %arg4[%c0_6, %c0_7] : memref<32x32xf32, #tpu.memory_space<vmem>>, vector<32x32xf32>
    tpu.vector_store %arg4[%c0_6, %c0_7], %7 {strides = array<i32>} : memref<32x32xf32, #tpu.memory_space<vmem>>, vector<32x32xf32>,
    return
  }
  func.func @transform_0(%arg0: i32) -> (i32, i32) {
    %c0_i32 = arith.constant 0 : i32
    %c0_i32_0 = arith.constant 0 : i32
    return %arg0, %c0_i32 : i32, i32
  }
  func.func @transform_1(%arg0: i32) -> (i32, i32) {
    %c0_i32 = arith.constant 0 : i32
    %c0_i32_0 = arith.constant 0 : i32
    %c0_i32_1 = arith.constant 0 : i32
    return %c0_i32, %c0_i32_0 : i32, i32
  }
  func.func @transform_2(%arg0: i32) -> (i32, i32) {
    %c0_i32 = arith.constant 0 : i32
    %c0_i32_0 = arith.constant 0 : i32
    %c0_i32_1 = arith.constant 0 : i32
    return %c0_i32, %c0_i32_0 : i32, i32
  }
  func.func @transform_3(%arg0: i32) -> (i32, i32) {
    %c0_i32 = arith.constant 0 : i32
    %c0_i32_0 = arith.constant 0 : i32
    return %arg0, %c0_i32 : i32, i32
  }
}

module attributes {stable_mosaic.version = 11 : i64} {
  func.func @_head_gumbel_kernel(%arg0: i32, %arg1: memref<32x32xf32, #tpu.memory_space<vmem>>, %arg2: memref<32x16xf32, #tpu.memory_space<vmem>>, %arg3: memref<1x16xf32, #tpu.memory_space<vmem>>, %arg4: memref<32x16xf32, #tpu.memory_space<vmem>>, %arg5: memref<32x16xf32, #tpu.memory_space<vmem>>, %arg6: memref<32x16xf32, #tpu.memory_space<vmem>>) attributes {dimension_semantics = [#tpu.dimension_semantics<arbitrary>], iteration_bounds = array<i64: 1>, scalar_prefetch = 0 : i64, scratch_operands = 0 : i64, tpu.core_type = #tpu.core_type<tc>, window_params = [{pipeline_mode = #tpu.pipeline_mode<synchronous>, transform_indices = @transform_0, window_bounds = array<i64: 32, 32>}, {pipeline_mode = #tpu.pipeline_mode<synchronous>, transform_indices = @transform_1, window_bounds = array<i64: 32, 16>}, {pipeline_mode = #tpu.pipeline_mode<synchronous>, transform_indices = @transform_2, window_bounds = array<i64: 1, 16>}, {pipeline_mode = #tpu.pipeline_mode<synchronous>, transform_indices = @transform_3, window_bounds = array<i64: 32, 16>}, {pipeline_mode = #tpu.pipeline_mode<synchronous>, transform_indices = @transform_4, window_bounds = array<i64: 32, 16>}, {pipeline_mode = #tpu.pipeline_mode<synchronous>, transform_indices = @transform_5, window_bounds = array<i64: 32, 16>}]} {
    %c0 = arith.constant 0 : index
    %c0_0 = arith.constant 0 : index
    %0 = vector.load %arg1[%c0, %c0_0] : memref<32x32xf32, #tpu.memory_space<vmem>>, vector<32x32xf32>
    %c0_1 = arith.constant 0 : index
    %c0_2 = arith.constant 0 : index
    %1 = vector.load %arg2[%c0_1, %c0_2] : memref<32x16xf32, #tpu.memory_space<vmem>>, vector<32x16xf32>
    %cst = arith.constant dense<0.000000e+00> : vector<32x16xf32>
    %2 = tpu.matmul %0, %1, %cst {dimension_numbers = #tpu.dot_dimension_numbers<[1], [0], [0], [1], [0, 0, 1, 1], [], []>} : vector<32x32xf32>, vector<32x16xf32>, vector<32x16xf32> -> vector<32x16xf32>
    %c0_3 = arith.constant 0 : index
    %c0_4 = arith.constant 0 : index
    %3 = vector.load %arg3[%c0_3, %c0_4] : memref<1x16xf32, #tpu.memory_space<vmem>>, vector<1x16xf32>
    %4 = vector.broadcast %3 : vector<1x16xf32> to vector<32x16xf32>
    %5 = arith.addf %2, %4 : vector<32x16xf32>
    %c0_5 = arith.constant 0 : index
    %c0_6 = arith.constant 0 : index
    %6 = vector.load %arg5[%c0_5, %c0_6] : memref<32x16xf32, #tpu.memory_space<vmem>>, vector<32x16xf32>
    tpu.vector_store %arg5[%c0_5, %c0_6], %5 {strides = array<i32>} : memref<32x16xf32, #tpu.memory_space<vmem>>, vector<32x16xf32>,
    %c0_7 = arith.constant 0 : index
    %c0_8 = arith.constant 0 : index
    %7 = vector.load %arg4[%c0_7, %c0_8] : memref<32x16xf32, #tpu.memory_space<vmem>>, vector<32x16xf32>
    %cst_9 = arith.constant 1.1920929E-7 : f32
    %cst_10 = arith.constant 0.99999988 : f32
    %8 = vector.broadcast %cst_9 : f32 to vector<32x16xf32>
    %9 = arith.maximumf %8, %7 : vector<32x16xf32>
    %10 = vector.broadcast %cst_10 : f32 to vector<32x16xf32>
    %11 = arith.minimumf %10, %9 : vector<32x16xf32>
    %12 = math.log %11 : vector<32x16xf32>
    %cst_11 = arith.constant 0.000000e+00 : f32
    %13 = vector.broadcast %cst_11 : f32 to vector<32x16xf32>
    %14 = arith.subf %13, %12 : vector<32x16xf32>
    %15 = math.log %14 : vector<32x16xf32>
    %cst_12 = arith.constant 0.000000e+00 : f32
    %16 = vector.broadcast %cst_12 : f32 to vector<32x16xf32>
    %17 = arith.subf %16, %15 : vector<32x16xf32>
    %18 = arith.addf %5, %17 : vector<32x16xf32>
    %cst_13 = arith.constant 2.000000e+00 : f32
    %19 = vector.broadcast %cst_13 : f32 to vector<32x16xf32>
    %20 = arith.mulf %18, %19 : vector<32x16xf32>
    %cst_14 = arith.constant dense<0xFF800000> : vector<32xf32>
    %21 = vector.multi_reduction <maximumf>, %20, %cst_14 [1] : vector<32x16xf32> to vector<32xf32>
    %22 = vector.shape_cast %21 : vector<32xf32> to vector<32x1xf32>
    %23 = vector.broadcast %22 : vector<32x1xf32> to vector<32x16xf32>
    %24 = arith.subf %20, %23 : vector<32x16xf32>
    %25 = math.exp %24 : vector<32x16xf32>
    %cst_15 = arith.constant dense<0.000000e+00> : vector<32xf32>
    %26 = vector.multi_reduction <add>, %25, %cst_15 [1] : vector<32x16xf32> to vector<32xf32>
    %27 = vector.shape_cast %26 : vector<32xf32> to vector<32x1xf32>
    %28 = tpu.reciprocal %27 {approx = true} : vector<32x1xf32> -> vector<32x1xf32>
    %29 = vector.broadcast %28 : vector<32x1xf32> to vector<32x16xf32>
    %30 = arith.mulf %25, %29 : vector<32x16xf32>
    %c0_16 = arith.constant 0 : index
    %c0_17 = arith.constant 0 : index
    %31 = vector.load %arg6[%c0_16, %c0_17] : memref<32x16xf32, #tpu.memory_space<vmem>>, vector<32x16xf32>
    tpu.vector_store %arg6[%c0_16, %c0_17], %30 {strides = array<i32>} : memref<32x16xf32, #tpu.memory_space<vmem>>, vector<32x16xf32>,
    return
  }
  func.func @transform_0(%arg0: i32) -> (i32, i32) {
    %c0_i32 = arith.constant 0 : i32
    %c0_i32_0 = arith.constant 0 : i32
    %c0_i32_1 = arith.constant 0 : i32
    return %c0_i32, %c0_i32_0 : i32, i32
  }
  func.func @transform_1(%arg0: i32) -> (i32, i32) {
    %c0_i32 = arith.constant 0 : i32
    %c0_i32_0 = arith.constant 0 : i32
    %c0_i32_1 = arith.constant 0 : i32
    return %c0_i32, %c0_i32_0 : i32, i32
  }
  func.func @transform_2(%arg0: i32) -> (i32, i32) {
    %c0_i32 = arith.constant 0 : i32
    %c0_i32_0 = arith.constant 0 : i32
    %c0_i32_1 = arith.constant 0 : i32
    return %c0_i32, %c0_i32_0 : i32, i32
  }
  func.func @transform_3(%arg0: i32) -> (i32, i32) {
    %c0_i32 = arith.constant 0 : i32
    %c0_i32_0 = arith.constant 0 : i32
    %c0_i32_1 = arith.constant 0 : i32
    return %c0_i32, %c0_i32_0 : i32, i32
  }
  func.func @transform_4(%arg0: i32) -> (i32, i32) {
    %c0_i32 = arith.constant 0 : i32
    %c0_i32_0 = arith.constant 0 : i32
    %c0_i32_1 = arith.constant 0 : i32
    return %c0_i32, %c0_i32_0 : i32, i32
  }
  func.func @transform_5(%arg0: i32) -> (i32, i32) {
    %c0_i32 = arith.constant 0 : i32
    %c0_i32_0 = arith.constant 0 : i32
    %c0_i32_1 = arith.constant 0 : i32
    return %c0_i32, %c0_i32_0 : i32, i32
  }
}

module attributes {stable_mosaic.version = 11 : i64} {
  func.func @_matmul_bias_kernel(%arg0: i32, %arg1: memref<32x144xbf16, #tpu.memory_space<vmem>>, %arg2: memref<144x32xbf16, #tpu.memory_space<vmem>>, %arg3: memref<1x32xf32, #tpu.memory_space<vmem>>, %arg4: memref<32x32xf32, #tpu.memory_space<vmem>>) attributes {dimension_semantics = [#tpu.dimension_semantics<parallel>], iteration_bounds = array<i64: 1>, scalar_prefetch = 0 : i64, scratch_operands = 0 : i64, tpu.core_type = #tpu.core_type<tc>, window_params = [{transform_indices = @transform_0, window_bounds = array<i64: 32, 144>}, {pipeline_mode = #tpu.pipeline_mode<synchronous>, transform_indices = @transform_1, window_bounds = array<i64: 144, 32>}, {pipeline_mode = #tpu.pipeline_mode<synchronous>, transform_indices = @transform_2, window_bounds = array<i64: 1, 32>}, {transform_indices = @transform_3, window_bounds = array<i64: 32, 32>}]} {
    %c0 = arith.constant 0 : index
    %c0_0 = arith.constant 0 : index
    %0 = vector.load %arg1[%c0, %c0_0] : memref<32x144xbf16, #tpu.memory_space<vmem>>, vector<32x144xbf16>
    %c0_1 = arith.constant 0 : index
    %c0_2 = arith.constant 0 : index
    %1 = vector.load %arg2[%c0_1, %c0_2] : memref<144x32xbf16, #tpu.memory_space<vmem>>, vector<144x32xbf16>
    %cst = arith.constant dense<0.000000e+00> : vector<32x32xf32>
    %2 = tpu.matmul %0, %1, %cst {dimension_numbers = #tpu.dot_dimension_numbers<[1], [0], [0], [1], [0, 0, 1, 1], [], []>} : vector<32x144xbf16>, vector<144x32xbf16>, vector<32x32xf32> -> vector<32x32xf32>
    %c0_3 = arith.constant 0 : index
    %c0_4 = arith.constant 0 : index
    %3 = vector.load %arg3[%c0_3, %c0_4] : memref<1x32xf32, #tpu.memory_space<vmem>>, vector<1x32xf32>
    %4 = vector.broadcast %3 : vector<1x32xf32> to vector<32x32xf32>
    %5 = arith.addf %2, %4 : vector<32x32xf32>
    %c0_5 = arith.constant 0 : index
    %c0_6 = arith.constant 0 : index
    %6 = vector.load %arg4[%c0_5, %c0_6] : memref<32x32xf32, #tpu.memory_space<vmem>>, vector<32x32xf32>
    tpu.vector_store %arg4[%c0_5, %c0_6], %5 {strides = array<i32>} : memref<32x32xf32, #tpu.memory_space<vmem>>, vector<32x32xf32>,
    return
  }
  func.func @transform_0(%arg0: i32) -> (i32, i32) {
    %c0_i32 = arith.constant 0 : i32
    %c0_i32_0 = arith.constant 0 : i32
    return %arg0, %c0_i32 : i32, i32
  }
  func.func @transform_1(%arg0: i32) -> (i32, i32) {
    %c0_i32 = arith.constant 0 : i32
    %c0_i32_0 = arith.constant 0 : i32
    %c0_i32_1 = arith.constant 0 : i32
    return %c0_i32, %c0_i32_0 : i32, i32
  }
  func.func @transform_2(%arg0: i32) -> (i32, i32) {
    %c0_i32 = arith.constant 0 : i32
    %c0_i32_0 = arith.constant 0 : i32
    %c0_i32_1 = arith.constant 0 : i32
    return %c0_i32, %c0_i32_0 : i32, i32
  }
  func.func @transform_3(%arg0: i32) -> (i32, i32) {
    %c0_i32 = arith.constant 0 : i32
    %c0_i32_0 = arith.constant 0 : i32
    return %arg0, %c0_i32 : i32, i32
  }
}

module attributes {stable_mosaic.version = 11 : i64} {
  func.func @_matmul_bias_kernel(%arg0: i32, %arg1: memref<32x288xbf16, #tpu.memory_space<vmem>>, %arg2: memref<288x128xbf16, #tpu.memory_space<vmem>>, %arg3: memref<1x128xf32, #tpu.memory_space<vmem>>, %arg4: memref<32x128xf32, #tpu.memory_space<vmem>>) attributes {dimension_semantics = [#tpu.dimension_semantics<parallel>], iteration_bounds = array<i64: 1>, scalar_prefetch = 0 : i64, scratch_operands = 0 : i64, tpu.core_type = #tpu.core_type<tc>, window_params = [{transform_indices = @transform_0, window_bounds = array<i64: 32, 288>}, {pipeline_mode = #tpu.pipeline_mode<synchronous>, transform_indices = @transform_1, window_bounds = array<i64: 288, 128>}, {pipeline_mode = #tpu.pipeline_mode<synchronous>, transform_indices = @transform_2, window_bounds = array<i64: 1, 128>}, {transform_indices = @transform_3, window_bounds = array<i64: 32, 128>}]} {
    %c0 = arith.constant 0 : index
    %c0_0 = arith.constant 0 : index
    %0 = vector.load %arg1[%c0, %c0_0] : memref<32x288xbf16, #tpu.memory_space<vmem>>, vector<32x288xbf16>
    %c0_1 = arith.constant 0 : index
    %c0_2 = arith.constant 0 : index
    %1 = vector.load %arg2[%c0_1, %c0_2] : memref<288x128xbf16, #tpu.memory_space<vmem>>, vector<288x128xbf16>
    %cst = arith.constant dense<0.000000e+00> : vector<32x128xf32>
    %2 = tpu.matmul %0, %1, %cst {dimension_numbers = #tpu.dot_dimension_numbers<[1], [0], [0], [1], [0, 0, 1, 1], [], []>} : vector<32x288xbf16>, vector<288x128xbf16>, vector<32x128xf32> -> vector<32x128xf32>
    %c0_3 = arith.constant 0 : index
    %c0_4 = arith.constant 0 : index
    %3 = vector.load %arg3[%c0_3, %c0_4] : memref<1x128xf32, #tpu.memory_space<vmem>>, vector<1x128xf32>
    %4 = vector.broadcast %3 : vector<1x128xf32> to vector<32x128xf32>
    %5 = arith.addf %2, %4 : vector<32x128xf32>
    %cst_5 = arith.constant 0.000000e+00 : f32
    %6 = vector.broadcast %cst_5 : f32 to vector<32x128xf32>
    %7 = arith.maximumf %5, %6 : vector<32x128xf32>
    %c0_6 = arith.constant 0 : index
    %c0_7 = arith.constant 0 : index
    %8 = vector.load %arg4[%c0_6, %c0_7] : memref<32x128xf32, #tpu.memory_space<vmem>>, vector<32x128xf32>
    tpu.vector_store %arg4[%c0_6, %c0_7], %7 {strides = array<i32>} : memref<32x128xf32, #tpu.memory_space<vmem>>, vector<32x128xf32>,
    return
  }
  func.func @transform_0(%arg0: i32) -> (i32, i32) {
    %c0_i32 = arith.constant 0 : i32
    %c0_i32_0 = arith.constant 0 : i32
    return %arg0, %c0_i32 : i32, i32
  }
  func.func @transform_1(%arg0: i32) -> (i32, i32) {
    %c0_i32 = arith.constant 0 : i32
    %c0_i32_0 = arith.constant 0 : i32
    %c0_i32_1 = arith.constant 0 : i32
    return %c0_i32, %c0_i32_0 : i32, i32
  }
  func.func @transform_2(%arg0: i32) -> (i32, i32) {
    %c0_i32 = arith.constant 0 : i32
    %c0_i32_0 = arith.constant 0 : i32
    %c0_i32_1 = arith.constant 0 : i32
    return %c0_i32, %c0_i32_0 : i32, i32
  }
  func.func @transform_3(%arg0: i32) -> (i32, i32) {
    %c0_i32 = arith.constant 0 : i32
    %c0_i32_0 = arith.constant 0 : i32
    return %arg0, %c0_i32 : i32, i32
  }
}

module attributes {stable_mosaic.version = 11 : i64} {
  func.func @_matmul_bias_kernel(%arg0: i32, %arg1: memref<128x288xbf16, #tpu.memory_space<vmem>>, %arg2: memref<288x12xbf16, #tpu.memory_space<vmem>>, %arg3: memref<1x12xf32, #tpu.memory_space<vmem>>, %arg4: memref<128x12xf32, #tpu.memory_space<vmem>>) attributes {dimension_semantics = [#tpu.dimension_semantics<parallel>], iteration_bounds = array<i64: 1>, scalar_prefetch = 0 : i64, scratch_operands = 0 : i64, tpu.core_type = #tpu.core_type<tc>, window_params = [{transform_indices = @transform_0, window_bounds = array<i64: 128, 288>}, {pipeline_mode = #tpu.pipeline_mode<synchronous>, transform_indices = @transform_1, window_bounds = array<i64: 288, 12>}, {pipeline_mode = #tpu.pipeline_mode<synchronous>, transform_indices = @transform_2, window_bounds = array<i64: 1, 12>}, {transform_indices = @transform_3, window_bounds = array<i64: 128, 12>}]} {
    %c0 = arith.constant 0 : index
    %c0_0 = arith.constant 0 : index
    %0 = vector.load %arg1[%c0, %c0_0] : memref<128x288xbf16, #tpu.memory_space<vmem>>, vector<128x288xbf16>
    %c0_1 = arith.constant 0 : index
    %c0_2 = arith.constant 0 : index
    %1 = vector.load %arg2[%c0_1, %c0_2] : memref<288x12xbf16, #tpu.memory_space<vmem>>, vector<288x12xbf16>
    %cst = arith.constant dense<0.000000e+00> : vector<128x12xf32>
    %2 = tpu.matmul %0, %1, %cst {dimension_numbers = #tpu.dot_dimension_numbers<[1], [0], [0], [1], [0, 0, 1, 1], [], []>} : vector<128x288xbf16>, vector<288x12xbf16>, vector<128x12xf32> -> vector<128x12xf32>
    %c0_3 = arith.constant 0 : index
    %c0_4 = arith.constant 0 : index
    %3 = vector.load %arg3[%c0_3, %c0_4] : memref<1x12xf32, #tpu.memory_space<vmem>>, vector<1x12xf32>
    %4 = vector.broadcast %3 : vector<1x12xf32> to vector<128x12xf32>
    %5 = arith.addf %2, %4 : vector<128x12xf32>
    %c0_5 = arith.constant 0 : index
    %c0_6 = arith.constant 0 : index
    %6 = vector.load %arg4[%c0_5, %c0_6] : memref<128x12xf32, #tpu.memory_space<vmem>>, vector<128x12xf32>
    tpu.vector_store %arg4[%c0_5, %c0_6], %5 {strides = array<i32>} : memref<128x12xf32, #tpu.memory_space<vmem>>, vector<128x12xf32>,
    return
  }
  func.func @transform_0(%arg0: i32) -> (i32, i32) {
    %c0_i32 = arith.constant 0 : i32
    %c0_i32_0 = arith.constant 0 : i32
    return %arg0, %c0_i32 : i32, i32
  }
  func.func @transform_1(%arg0: i32) -> (i32, i32) {
    %c0_i32 = arith.constant 0 : i32
    %c0_i32_0 = arith.constant 0 : i32
    %c0_i32_1 = arith.constant 0 : i32
    return %c0_i32, %c0_i32_0 : i32, i32
  }
  func.func @transform_2(%arg0: i32) -> (i32, i32) {
    %c0_i32 = arith.constant 0 : i32
    %c0_i32_0 = arith.constant 0 : i32
    %c0_i32_1 = arith.constant 0 : i32
    return %c0_i32, %c0_i32_0 : i32, i32
  }
  func.func @transform_3(%arg0: i32) -> (i32, i32) {
    %c0_i32 = arith.constant 0 : i32
    %c0_i32_0 = arith.constant 0 : i32
    return %arg0, %c0_i32 : i32, i32
  }
}

</mosaic_0001>

<bundles_post_ra>
// kernel: model_v2_forward.6
= control target key start
LH: loop header
LB: loop body
LE: loop exit
PB: predicated region body
PF: predicated region fallthrough
CT: control target
= control target key end

     0   :  { %vm102_vm0 = vcmask 392192   ;;  %vm240_vm1 = vcmask 261120   ;;  %s459_s1 = inlined_call_operand.vmem [shape: bf16[48,32], index: 1, kind: input, shape index: {}]   ;;  %s460_s0 = inlined_call_operand.vmem [shape: bf16[128,48], index: 0, kind: input, shape index: {}]   ;;  %s461_s2 = inlined_call_operand.vmem [shape: f32[1,32], index: 2, kind: input, shape index: {}]   ;;  %s462_s3 = inlined_call_operand.vmem [shape: f32[128,32], index: 3, kind: output, shape index: {}]  }
   0x1   :  { %v320_v0 = vld [vmem:[%s459_s1 + $0x10] sm:$0xff]   ;;  %v321_v1 = vld [vmem:[%s459_s1 + $0x8] sm:$0xff]   ;;  %v322_v2 = vld [vmem:[%s459_s1] sm:$0xff]  }
   0x2   :  { %292 = vmatprep.subr.bf16.mxu0 %v320_v0  ;;  %314 = vmatprep.subr.bf16.mxu1 %v320_v0  ;;  %v323_v3 = vld [vmem:[%s460_s0] sm:$0xff]   ;;  %v325_v5 = vld [vmem:[%s460_s0 + $0x8] sm:$0xff]   ;;  %v327_v7 = vld [vmem:[%s460_s0 + $0x10] sm:$0xff]  }
   0x3   :  { %293 = vmatpush3.bf16.msra.mxu0 %v320_v0  ;;  %317 = vmatpush3.bf16.msra.mxu1 %v320_v0  ;;  %v324_v4 = vld [vmem:[%s460_s0 + $0x20] sm:$0xff]   ;;  %v326_v6 = vld [vmem:[%s460_s0 + $0x28] sm:$0xff]   ;;  %v328_v8 = vld [vmem:[%s460_s0 + $0x30] sm:$0xff]  }
   0x4   :  { %294 = vmatprep.subr.bf16.mxu0 %v321_v1  ;;  %315 = vmatprep.subr.bf16.mxu1 %v321_v1  ;;  %v329_v9 = vld [vmem:[%s460_s0 + $0x18] sm:$0xff]   ;;  %v261_v11 = vld [vmem:[%s461_s2] ss:$0 sm:$0xff] }
   0x5   :  { %298 = vmatprep.mubr.msk.bf16.mxu0 %vm102_vm0, %v323_v3  ;;  %306 = vmatprep.mubr.msk.bf16.mxu1 %vm102_vm0, %v324_v4  ;;  %v330_v10 = vld [vmem:[%s460_s0 + $0x38] sm:$0xff]  }
   0x7   :  { %295 = vmatpush3.bf16.msra.mxu0 %v321_v1  ;;  %318 = vmatpush3.bf16.msra.mxu1 %v321_v1 }
   0x8   :  { %296 = vmatprep.subr.bf16.mxu0 %v322_v2  ;;  %316 = vmatprep.subr.bf16.mxu1 %v322_v2 }
   0xb   :  { %297 = vmatpush3.bf16.msra.mxu0 %v322_v2  ;;  %319 = vmatpush3.bf16.msra.mxu1 %v322_v2 }
   0xe   :  { %299 = vmatmul.mubr.msk.bf16.vlgmr.msra.gmra.mxu0 %vm102_vm0, %v325_v5  ;;  %307 = vmatmul.mubr.msk.bf16.vlgmr.msra.gmra.mxu1 %vm102_vm0, %v326_v6 }
   0xf   :  { %302 = vmatprep.mubr.msk.bf16.mxu0 %vm102_vm0, %v327_v7  ;;  %310 = vmatprep.mubr.msk.bf16.mxu1 %vm102_vm0, %v328_v8 }
  0x16   :  { %303 = vmatmul.mubr.msk.bf16.gmra.mxu0 %vm102_vm0, %v329_v9  ;;  %311 = vmatmul.mubr.msk.bf16.gmra.mxu1 %vm102_vm0, %v330_v10 }
  0xce   :  { %v300_v12 = vpop.f32.mrf.mxu0  ;;  %v308_v13 = vpop.f32.mrf.mxu1 }
  0xcf   :  { %v170_v14 = vadd.f32 %v300_v12, %v261_v11  ;;  %v202_v15 = vadd.f32 %v308_v13, %v261_v11 }
  0xd0   :  { %v161_v16 = vpop.f32.mrf.mxu0  ;;  %v193_v17 = vpop.f32.mrf.mxu1 }
  0xd1   :  { %v226_v18 = vmax.f32 %v170_v14, 0.0  ;;  %v234_v19 = vmax.f32 %v202_v15, 0.0  ;;  %v162_v20 = vadd.f32 %v261_v11, %v161_v16  ;;  %v194_v21 = vadd.f32 %v261_v11, %v193_v17 }
  0xd2   :  { %v301_v22 = vpop.f32.mrf.mxu0  ;;  %v309_v23 = vpop.f32.mrf.mxu1 }
  0xd3   :  { %243 = vst.msk [vmem:[%s462_s3 + $0x10] sm:$0xff] %vm240_vm1, %v226_v18  ;;  %251 = vst.msk [vmem:[%s462_s3 + $0x50] sm:$0xff] %vm240_vm1, %v234_v19  ;;  %v224_v24 = vmax.f32 %v162_v20, 0.0  ;;  %v232_v25 = vmax.f32 %v194_v21, 0.0  ;;  %v173_v26 = vadd.f32 %v301_v22, %v261_v11  ;;  %v205_v27 = vadd.f32 %v309_v23, %v261_v11 }
  0xd4   :  { %v164_v28 = vpop.f32.mrf.mxu0  ;;  %v196_v29 = vpop.f32.mrf.mxu1 }
  0xd5   :  { %241 = vst.msk [vmem:[%s462_s3] sm:$0xff] %vm240_vm1, %v224_v24  ;;  %249 = vst.msk [vmem:[%s462_s3 + $0x40] sm:$0xff] %vm240_vm1, %v232_v25  ;;  %v227_v30 = vmax.f32 %v173_v26, 0.0  ;;  %v235_v31 = vmax.f32 %v205_v27, 0.0  ;;  %v165_v32 = vadd.f32 %v261_v11, %v164_v28  ;;  %v197_v33 = vadd.f32 %v261_v11, %v196_v29 }
  0xd6   :  { %v304_v34 = vpop.f32.mrf.mxu0  ;;  %v312_v35 = vpop.f32.mrf.mxu1 }
  0xd7   :  { %244 = vst.msk [vmem:[%s462_s3 + $0x18] sm:$0xff] %vm240_vm1, %v227_v30  ;;  %252 = vst.msk [vmem:[%s462_s3 + $0x58] sm:$0xff] %vm240_vm1, %v235_v31  ;;  %v225_v36 = vmax.f32 %v165_v32, 0.0  ;;  %v233_v37 = vmax.f32 %v197_v33, 0.0  ;;  %v186_v38 = vadd.f32 %v304_v34, %v261_v11  ;;  %v218_v39 = vadd.f32 %v312_v35, %v261_v11 }
  0xd8   :  { %v177_v40 = vpop.f32.mrf.mxu0  ;;  %v209_v41 = vpop.f32.mrf.mxu1 }
  0xd9   :  { %242 = vst.msk [vmem:[%s462_s3 + $0x8] sm:$0xff] %vm240_vm1, %v225_v36  ;;  %250 = vst.msk [vmem:[%s462_s3 + $0x48] sm:$0xff] %vm240_vm1, %v233_v37  ;;  %v230_v42 = vmax.f32 %v186_v38, 0.0  ;;  %v238_v43 = vmax.f32 %v218_v39, 0.0  ;;  %v178_v44 = vadd.f32 %v261_v11, %v177_v40  ;;  %v210_v45 = vadd.f32 %v261_v11, %v209_v41 }
  0xda   :  { %v305_v46 = vpop.f32.mrf.mxu0  ;;  %v313_v47 = vpop.f32.mrf.mxu1 }
  0xdb   :  { %247 = vst.msk [vmem:[%s462_s3 + $0x30] sm:$0xff] %vm240_vm1, %v230_v42  ;;  %255 = vst.msk [vmem:[%s462_s3 + $0x70] sm:$0xff] %vm240_vm1, %v238_v43  ;;  %v228_v48 = vmax.f32 %v178_v44, 0.0  ;;  %v236_v49 = vmax.f32 %v210_v45, 0.0  ;;  %v189_v50 = vadd.f32 %v305_v46, %v261_v11  ;;  %v221_v51 = vadd.f32 %v313_v47, %v261_v11 }
  0xdc   :  { %v180_v52 = vpop.f32.mrf.mxu0  ;;  %v212_v53 = vpop.f32.mrf.mxu1 }
  0xdd   :  { %245 = vst.msk [vmem:[%s462_s3 + $0x20] sm:$0xff] %vm240_vm1, %v228_v48  ;;  %253 = vst.msk [vmem:[%s462_s3 + $0x60] sm:$0xff] %vm240_vm1, %v236_v49  ;;  %v231_v54 = vmax.f32 %v189_v50, 0.0  ;;  %v239_v55 = vmax.f32 %v221_v51, 0.0  ;;  %v181_v56 = vadd.f32 %v261_v11, %v180_v52  ;;  %v213_v57 = vadd.f32 %v261_v11, %v212_v53 }
  0xdf   :  { %248 = vst.msk [vmem:[%s462_s3 + $0x38] sm:$0xff] %vm240_vm1, %v231_v54  ;;  %256 = vst.msk [vmem:[%s462_s3 + $0x78] sm:$0xff] %vm240_vm1, %v239_v55  ;;  %v229_v58 = vmax.f32 %v181_v56, 0.0  ;;  %v237_v59 = vmax.f32 %v213_v57, 0.0 }
  0xe1   :  { %246 = vst.msk [vmem:[%s462_s3 + $0x28] sm:$0xff] %vm240_vm1, %v229_v58  ;;  %254 = vst.msk [vmem:[%s462_s3 + $0x68] sm:$0xff] %vm240_vm1, %v237_v59 }

// kernel: model_v2_forward.7
= control target key start
LH: loop header
LB: loop body
LE: loop exit
PB: predicated region body
PF: predicated region fallthrough
CT: control target
= control target key end

     0   :  { %vm428_vm0 = vcmask 261120   ;;  %s737_s1 = inlined_call_operand.vmem [shape: bf16[512,32], index: 1, kind: input, shape index: {}]   ;;  %s738_s0 = inlined_call_operand.vmem [shape: bf16[32,512], index: 0, kind: input, shape index: {}]   ;;  %s739_s2 = inlined_call_operand.vmem [shape: f32[1,32], index: 2, kind: input, shape index: {}]   ;;  %s740_s3 = inlined_call_operand.vmem [shape: f32[32,32], index: 3, kind: output, shape index: {}]  }
   0x1   :  { %v534_v0 = vld [vmem:[%s737_s1 + $0x78] sm:$0xff]   ;;  %v538_v4 = vld [vmem:[%s737_s1 + $0x70] sm:$0xff]   ;;  %v542_v8 = vld [vmem:[%s737_s1 + $0x68] sm:$0xff]  }
   0x2   :  { %v535_v1 = vld [vmem:[%s737_s1 + $0xf8] sm:$0xff]   ;;  %478 = vmatprep.subr.bf16.mxu0 %v534_v0  ;;  %v539_v5 = vld [vmem:[%s737_s1 + $0xf0] sm:$0xff]   ;;  %v543_v9 = vld [vmem:[%s737_s1 + $0xe8] sm:$0xff]  }
   0x3   :  { %v536_v2 = vld [vmem:[%s737_s1 + $0x38] sm:$0xff]   ;;  %506 = vmatprep.subr.bf16.mxu1 %v535_v1  ;;  %v540_v6 = vld [vmem:[%s737_s1 + $0x30] sm:$0xff]   ;;  %v544_v10 = vld [vmem:[%s737_s1 + $0x28] sm:$0xff]  }
   0x4   :  { %v537_v3 = vld [vmem:[%s737_s1 + $0xb8] sm:$0xff]   ;;  %479 = vmatpush3.bf16.msra.mxu0 %v536_v2  ;;  %v541_v7 = vld [vmem:[%s737_s1 + $0xb0] sm:$0xff]   ;;  %v545_v11 = vld [vmem:[%s737_s1 + $0xa8] sm:$0xff]  }
   0x5   :  { %507 = vmatpush3.bf16.msra.mxu1 %v537_v3  ;;  %480 = vmatprep.subr.bf16.mxu0 %v538_v4  ;;  %v546_v12 = vld [vmem:[%s737_s1 + $0x60] sm:$0xff]   ;;  %v550_v16 = vld [vmem:[%s737_s1 + $0x58] sm:$0xff]   ;;  %v554_v20 = vld [vmem:[%s737_s1 + $0x50] sm:$0xff]  }
   0x6   :  { %508 = vmatprep.subr.bf16.mxu1 %v539_v5  ;;  %v547_v13 = vld [vmem:[%s737_s1 + $0xe0] sm:$0xff]   ;;  %v551_v17 = vld [vmem:[%s737_s1 + $0xd8] sm:$0xff]   ;;  %v555_v21 = vld [vmem:[%s737_s1 + $0xd0] sm:$0xff]  }
   0x7   :  { %v548_v14 = vld [vmem:[%s737_s1 + $0x20] sm:$0xff]   ;;  %v552_v18 = vld [vmem:[%s737_s1 + $0x18] sm:$0xff]   ;;  %v556_v22 = vld [vmem:[%s737_s1 + $0x10] sm:$0xff]  }
   0x8   :  { %481 = vmatpush3.bf16.msra.mxu0 %v540_v6  ;;  %v549_v15 = vld [vmem:[%s737_s1 + $0xa0] sm:$0xff]   ;;  %v553_v19 = vld [vmem:[%s737_s1 + $0x98] sm:$0xff]   ;;  %v557_v23 = vld [vmem:[%s737_s1 + $0x90] sm:$0xff]  }
   0x9   :  { %509 = vmatpush3.bf16.msra.mxu1 %v541_v7  ;;  %482 = vmatprep.subr.bf16.mxu0 %v542_v8  ;;  %v558_v24 = vld [vmem:[%s737_s1 + $0x48] sm:$0xff]   ;;  %v562_v28 = vld [vmem:[%s737_s1 + $0x40] sm:$0xff]  }
   0xa   :  { %510 = vmatprep.subr.bf16.mxu1 %v543_v9  ;;  %v559_v25 = vld [vmem:[%s737_s1 + $0xc8] sm:$0xff]   ;;  %v563_v29 = vld [vmem:[%s737_s1 + $0xc0] sm:$0xff]  }
   0xb   :  { %v560_v26 = vld [vmem:[%s737_s1 + $0x8] sm:$0xff]   ;;  %v564_v30 = vld [vmem:[%s737_s1] sm:$0xff]  }
   0xc   :  { %483 = vmatpush3.bf16.msra.mxu0 %v544_v10  ;;  %v561_v27 = vld [vmem:[%s737_s1 + $0x88] sm:$0xff]   ;;  %v565_v31 = vld [vmem:[%s737_s1 + $0x80] sm:$0xff]  }
   0xd   :  { %511 = vmatpush3.bf16.msra.mxu1 %v545_v11  ;;  %484 = vmatprep.subr.bf16.mxu0 %v546_v12  ;;  %v566_v32 = vld [vmem:[%s738_s0] ss:$16 sps:$4 sm:$0xff]   ;;  %v568_v33 = vld [vmem:[%s738_s0 + $0x4] ss:$16 sps:$4 sm:$0xff]   ;;  %v569_v34 = vld [vmem:[%s738_s0 + $0x8] ss:$16 sps:$4 sm:$0xff]  }
   0xe   :  { %512 = vmatprep.subr.bf16.mxu1 %v547_v13  ;;  %v571_v35 = vld [vmem:[%s738_s0 + $0xc] ss:$16 sps:$4 sm:$0xff]   ;;  %358 = vmatprep.mubr.bf16.mxu0 %v568_v33  ;;  %v572_v36 = vld [vmem:[%s738_s0 + $0x24] ss:$16 sps:$4 sm:$0xff]   ;;  %v576_v38 = vld [vmem:[%s738_s0 + $0x20] ss:$16 sps:$4 sm:$0xff]  }
   0xf   :  { %407 = vmatprep.mubr.bf16.mxu1 %v571_v35  ;;  %v574_v37 = vld [vmem:[%s738_s0 + $0x2c] ss:$16 sps:$4 sm:$0xff]   ;;  %v577_v39 = vld [vmem:[%s738_s0 + $0x28] ss:$16 sps:$4 sm:$0xff]   ;;  %v437_v42 = vld [vmem:[%s739_s2] ss:$0 sm:$0xff] }
  0x10   :  { %485 = vmatpush3.bf16.msra.mxu0 %v548_v14 }
  0x11   :  { %513 = vmatpush3.bf16.msra.mxu1 %v549_v15  ;;  %486 = vmatprep.subr.bf16.mxu0 %v550_v16 }
  0x12   :  { %514 = vmatprep.subr.bf16.mxu1 %v551_v17 }
  0x14   :  { %487 = vmatpush3.bf16.msra.mxu0 %v552_v18 }
  0x15   :  { %515 = vmatpush3.bf16.msra.mxu1 %v553_v19  ;;  %488 = vmatprep.subr.bf16.mxu0 %v554_v20 }
  0x16   :  { %516 = vmatprep.subr.bf16.mxu1 %v555_v21 }
  0x18   :  { %489 = vmatpush3.bf16.msra.mxu0 %v556_v22 }
  0x19   :  { %517 = vmatpush3.bf16.msra.mxu1 %v557_v23  ;;  %490 = vmatprep.subr.bf16.mxu0 %v558_v24 }
  0x1a   :  { %518 = vmatprep.subr.bf16.mxu1 %v559_v25 }
  0x1c   :  { %491 = vmatpush3.bf16.msra.mxu0 %v560_v26 }
  0x1d   :  { %519 = vmatpush3.bf16.msra.mxu1 %v561_v27  ;;  %492 = vmatprep.subr.bf16.mxu0 %v562_v28 }
  0x1e   :  { %520 = vmatprep.subr.bf16.mxu1 %v563_v29 }
  0x20   :  { %493 = vmatpush3.bf16.msra.mxu0 %v564_v30 }
  0x21   :  { %521 = vmatpush3.bf16.msra.mxu1 %v565_v31 }
  0x23   :  { %359 = vmatmul.mubr.bf16.vlgmr.msra.gmra.mxu0 %v566_v32 }
  0x24   :  { %408 = vmatmul.mubr.bf16.vlgmr.msra.gmra.mxu1 %v569_v34  ;;  %366 = vmatprep.mubr.bf16.mxu0 %v572_v36 }
  0x25   :  { %415 = vmatprep.mubr.bf16.mxu1 %v574_v37 }
  0x2b   :  { %367 = vmatmul.mubr.bf16.gmra.mxu0 %v576_v38 }
  0x2c   :  { %416 = vmatmul.mubr.bf16.gmra.mxu1 %v577_v39 }
  0xe3   :  { %v494_v40 = vpop.f32.mrf.mxu0 }
  0xe4   :  { %v522_v41 = vpop.f32.mrf.mxu1 }
  0xe5   :  { %v495_v43 = vpop.f32.mrf.mxu0 }
  0xe6   :  { %v496_v44 = vadd.f32 %v495_v43, %v494_v40  ;;  %v523_v45 = vpop.f32.mrf.mxu1 }
  0xe7   :  { %v497_v46 = vpop.f32.mrf.mxu0  ;;  %v524_v48 = vadd.f32 %v523_v45, %v522_v41 }
  0xe8   :  { %v361_v47 = vadd.f32 %v496_v44, %v437_v42  ;;  %v525_v49 = vpop.f32.mrf.mxu1 }
  0xe9   :  { %v498_v50 = vpop.f32.mrf.mxu0 }
  0xea   :  { %v410_v51 = vadd.f32 %v524_v48, %v361_v47  ;;  %v499_v52 = vadd.f32 %v498_v50, %v497_v46  ;;  %v526_v53 = vpop.f32.mrf.mxu1 }
  0xeb   :  { %v500_v54 = vpop.f32.mrf.mxu0  ;;  %v527_v57 = vadd.f32 %v526_v53, %v525_v49 }
  0xec   :  { %v424_v55 = vmax.f32 %v410_v51, 0.0  ;;  %v364_v56 = vadd.f32 %v499_v52, %v437_v42  ;;  %v528_v58 = vpop.f32.mrf.mxu1 }
  0xed   :  { %v501_v59 = vpop.f32.mrf.mxu0 }
  0xee   :  { %429 = vst.msk [vmem:[%s740_s3] sm:$0xff] %vm428_vm0, %v424_v55  ;;  %v413_v60 = vadd.f32 %v527_v57, %v364_v56  ;;  %v502_v61 = vadd.f32 %v501_v59, %v500_v54  ;;  %v529_v62 = vpop.f32.mrf.mxu1 }
  0xef   :  { %v503_v63 = vpop.f32.mrf.mxu0  ;;  %v530_v2 = vadd.f32 %v529_v62, %v528_v58 }
  0xf0   :  { %v425_v0 = vmax.f32 %v413_v60, 0.0  ;;  %v369_v1 = vadd.f32 %v502_v61, %v437_v42  ;;  %v531_v3 = vpop.f32.mrf.mxu1 }
  0xf1   :  { %v504_v4 = vpop.f32.mrf.mxu0 }
  0xf2   :  { %430 = vst.msk [vmem:[%s740_s3 + $0x8] sm:$0xff] %vm428_vm0, %v425_v0  ;;  %v418_v5 = vadd.f32 %v530_v2, %v369_v1  ;;  %v505_v6 = vadd.f32 %v504_v4, %v503_v63  ;;  %v532_v7 = vpop.f32.mrf.mxu1 }
  0xf3   :  { %v533_v10 = vadd.f32 %v532_v7, %v531_v3 }
  0xf4   :  { %v426_v8 = vmax.f32 %v418_v5, 0.0  ;;  %v372_v9 = vadd.f32 %v505_v6, %v437_v42 }
  0xf6   :  { %431 = vst.msk [vmem:[%s740_s3 + $0x10] sm:$0xff] %vm428_vm0, %v426_v8  ;;  %v421_v11 = vadd.f32 %v533_v10, %v372_v9 }
  0xf8   :  { %v427_v12 = vmax.f32 %v421_v11, 0.0 }
  0xfa   :  { %432 = vst.msk [vmem:[%s740_s3 + $0x18] sm:$0xff] %vm428_vm0, %v427_v12 }

// kernel: model_v2_forward.8
= control target key start
LH: loop header
LB: loop body
LE: loop exit
PB: predicated region body
PF: predicated region fallthrough
CT: control target
= control target key end

     0   :  { %vm34_vm0 = vcmask 261120   ;;  %vm132_vm1 = vcmask 130048   ;;  %s413_s1 = inlined_call_operand.vmem [shape: f32[32,16], index: 1, kind: input, shape index: {}]   ;;  %s414_s0 = inlined_call_operand.vmem [shape: f32[32,32], index: 0, kind: input, shape index: {}]   ;;  %s415_s3 = inlined_call_operand.vmem [shape: f32[32,16], index: 3, kind: input, shape index: {}]   ;;  %s416_s2 = inlined_call_operand.vmem [shape: f32[1,16], index: 2, kind: input, shape index: {}]   ;;  %s417_s4 = inlined_call_operand.vmem [shape: f32[32,16], index: 4, kind: output, shape index: {0}]   ;;  %s418_s5 = inlined_call_operand.vmem [shape: f32[32,16], index: 5, kind: output, shape index: {1}]  }
   0x1   :  { %v26_v0 = vld [vmem:[%s413_s1 + $0x18] sm:$0xff]  ;;  %v25_v1 = vld [vmem:[%s413_s1 + $0x10] sm:$0xff]  ;;  %v24_v2 = vld [vmem:[%s413_s1 + $0x8] sm:$0xff] }
   0x2   :  { %250 = vmatprep.subr.mxu0 %v26_v0  ;;  %264 = vmatprep.subr.mxu1 %v26_v0  ;;  %v23_v3 = vld [vmem:[%s413_s1] sm:$0xff]  ;;  %v21_v5 = vld [vmem:[%s414_s0 + $0x10] sm:$0xff]  ;;  %v20_v6 = vld [vmem:[%s414_s0 + $0x8] sm:$0xff] }
   0x3   :  { %251 = vmatpush3.msra.mxu0 %v26_v0  ;;  %268 = vmatpush3.msra.mxu1 %v26_v0  ;;  %v19_v4 = vld [vmem:[%s414_s0] sm:$0xff]  ;;  %v22_v7 = vld [vmem:[%s414_s0 + $0x18] sm:$0xff]  ;;  %v138_v8 = vld [vmem:[%s415_s3 + $0x8] sm:$0xff] }
   0x4   :  { %252 = vmatprep.subr.mxu0 %v25_v1  ;;  %265 = vmatprep.subr.mxu1 %v25_v1  ;;  %v139_v9 = vld [vmem:[%s415_s3 + $0x10] sm:$0xff]  ;;  %v137_v10 = vld [vmem:[%s415_s3] sm:$0xff]  ;;  %v142_v11 = vmax.f32 %v138_v8, 1.1920929e-07  ;;  %v140_v12 = vld [vmem:[%s415_s3 + $0x18] sm:$0xff] }
   0x5   :  { %253 = vmatpush3.msra.mxu0 %v25_v1  ;;  %269 = vmatpush3.msra.mxu1 %v25_v1  ;;  %v143_v13 = vmax.f32 %v139_v9, 1.1920929e-07  ;;  %v141_v14 = vmax.f32 %v137_v10, 1.1920929e-07  ;;  %v144_v15 = vmax.f32 %v140_v12, 1.1920929e-07  ;;  %v237_v40 = vld [vmem:[%s416_s2] ss:$0 sm:$0xff] }
   0x6   :  { %254 = vmatprep.subr.mxu0 %v24_v2  ;;  %266 = vmatprep.subr.mxu1 %v24_v2  ;;  %v146_v16 = vmin.f32 %v142_v11, 0.9999999 }
   0x7   :  { %255 = vmatpush3.msra.mxu0 %v24_v2  ;;  %270 = vmatpush3.msra.mxu1 %v24_v2  ;;  %v147_v17 = vmin.f32 %v143_v13, 0.9999999  ;;  %v145_v18 = vmin.f32 %v141_v14, 0.9999999  ;;  %v148_v19 = vmin.f32 %v144_v15, 0.9999999 }
   0x8   :  { %256 = vmatprep.subr.mxu0 %v23_v3  ;;  %267 = vmatprep.subr.mxu1 %v23_v3  ;;  %272 = vlog2.f32 %v146_v16 }
   0x9   :  { %257 = vmatpush3.msra.mxu0 %v23_v3  ;;  %271 = vmatpush3.msra.mxu1 %v23_v3  ;;  %274 = vlog2.f32 %v147_v17 }
   0xa   :  { %258 = vmatprep.mubr.msk.f32.mxu0 %vm34_vm0, %v19_v4  ;;  %261 = vmatprep.mubr.msk.f32.mxu1 %vm34_vm0, %v21_v5  ;;  %276 = vlog2.f32 %v145_v18 }
   0xb   :  { %259 = vmatmul.mubr.msk.f32.vlgmr.msra.gmra.mxu0 %vm34_vm0, %v20_v6  ;;  %262 = vmatmul.mubr.msk.f32.vlgmr.msra.gmra.mxu1 %vm34_vm0, %v22_v7  ;;  %278 = vlog2.f32 %v148_v19 }
  0x15   :  { %v273_v20 = vpop.eup %272 }
  0x16   :  { %v275_v21 = vpop.eup %274  ;;  %v152_v24 = vmul.f32 0.6931472, %v273_v20 }
  0x17   :  { %v277_v22 = vpop.eup %276  ;;  %v154_v25 = vmul.f32 0.6931472, %v275_v21 }
  0x18   :  { %v279_v23 = vpop.eup %278  ;;  %v150_v26 = vmul.f32 0.6931472, %v277_v22  ;;  %v158_v28 = vsub.f32 0.0, %v152_v24 }
  0x19   :  { %v156_v27 = vmul.f32 0.6931472, %v279_v23  ;;  %v159_v29 = vsub.f32 0.0, %v154_v25 }
  0x1a   :  { %v157_v30 = vsub.f32 0.0, %v150_v26  ;;  %280 = vlog2.f32 %v158_v28 }
  0x1b   :  { %v160_v31 = vsub.f32 0.0, %v156_v27  ;;  %282 = vlog2.f32 %v159_v29 }
  0x1c   :  { %284 = vlog2.f32 %v157_v30 }
  0x1d   :  { %286 = vlog2.f32 %v160_v31 }
  0x27   :  { %v281_v32 = vpop.eup %280 }
  0x28   :  { %v283_v33 = vpop.eup %282  ;;  %v164_v36 = vmul.f32 0.6931472, %v281_v32 }
  0x29   :  { %v285_v34 = vpop.eup %284  ;;  %v166_v37 = vmul.f32 0.6931472, %v283_v33 }
  0x2a   :  { %v287_v35 = vpop.eup %286  ;;  %v162_v39 = vmul.f32 0.6931472, %v285_v34  ;;  %v170_v42 = vsub.f32 0.0, %v164_v36 }
  0x2b   :  { %v168_v38 = vmul.f32 0.6931472, %v287_v35  ;;  %v171_v44 = vsub.f32 0.0, %v166_v37 }
  0x2c   :  { %v169_v48 = vsub.f32 0.0, %v162_v39 }
  0x2d   :  { %v172_v47 = vsub.f32 0.0, %v168_v38 }
  0xcb   :  { %v260_v41 = vpop.f32.mrf.mxu0  ;;  %v263_v43 = vpop.f32.mrf.mxu1 }
  0xcc   :  { %v119_v45 = vadd.f32 %v260_v41, %v237_v40  ;;  %v129_v46 = vadd.f32 %v263_v43, %v237_v40 }
  0xcd   :  { %v113_v49 = vpop.f32.mrf.mxu0  ;;  %v123_v50 = vpop.f32.mrf.mxu1 }
  0xce   :  { %134 = vst.msk [vmem:[%s417_s4 + $0x8] sm:$0xff] %vm132_vm1, %v119_v45  ;;  %136 = vst.msk [vmem:[%s417_s4 + $0x18] sm:$0xff] %vm132_vm1, %v129_v46  ;;  %v114_v51 = vadd.f32 %v237_v40, %v113_v49  ;;  %v124_v52 = vadd.f32 %v237_v40, %v123_v50  ;;  %v174_v53 = vadd.f32 %v170_v42, %v119_v45 }
  0xcf   :  { %v176_v54 = vadd.f32 %v172_v47, %v129_v46 }
  0xd0   :  { %133 = vst.msk [vmem:[%s417_s4] sm:$0xff] %vm132_vm1, %v114_v51  ;;  %135 = vst.msk [vmem:[%s417_s4 + $0x10] sm:$0xff] %vm132_vm1, %v124_v52  ;;  %v175_v55 = vadd.f32 %v171_v44, %v124_v52  ;;  %v173_v56 = vadd.f32 %v169_v48, %v114_v51  ;;  %v178_v62 = vmul.f32 2.0, %v174_v53 }
  0xd1   :  { %v180_v61 = vmul.f32 2.0, %v176_v54 }
  0xd2   :  { %v179_v57 = vmul.f32 2.0, %v175_v55  ;;  %v177_v58 = vmul.f32 2.0, %v173_v56  ;;  %v184_v0 = vsel %vm132_vm1, %v178_v62, -inf }
  0xd3   :  { %v190_v63 = vsel %vm132_vm1, %v180_v61, -inf }
  0xd4   :  { %v187_v59 = vsel %vm132_vm1, %v179_v57, -inf  ;;  %v181_v60 = vsel %vm132_vm1, %v177_v58, -inf }
  0xd5   :  { %188 = vmax.xlane.f32.xlu1 %v187_v59  ;;  %182 = vmax.xlane.f32.xlu0 %v181_v60 }
  0xd9   :  { %191 = vmax.xlane.f32.xlu1 %v190_v63  ;;  %185 = vmax.xlane.f32.xlu0 %v184_v0 }
 0x15e   :  { %v189_v1 = vpop.xlane.xlu1 %188  ;;  %v183_v2 = vpop.xlane.xlu0 %182 }
 0x15f   :  { %v195_v3 = vsub.f32 %v179_v57, %v189_v1  ;;  %v193_v4 = vsub.f32 %v177_v58, %v183_v2 }
 0x161   :  { %v197_v5 = vmul.f32 1.442695, %v193_v4  ;;  %v201_v6 = vmul.f32 1.442695, %v195_v3 }
 0x162   :  { %v192_v7 = vpop.xlane.xlu1 %191  ;;  %v186_v8 = vpop.xlane.xlu0 %185 }
 0x163   :  { %v196_v9 = vsub.f32 %v180_v61, %v192_v7  ;;  %v194_v10 = vsub.f32 %v178_v62, %v186_v8  ;;  %288 = vpow2.f32 %v197_v5 }
 0x164   :  { %290 = vpow2.f32 %v201_v6 }
 0x165   :  { %v199_v11 = vmul.f32 1.442695, %v194_v10  ;;  %v203_v12 = vmul.f32 1.442695, %v196_v9 }
 0x167   :  { %292 = vpow2.f32 %v199_v11 }
 0x168   :  { %294 = vpow2.f32 %v203_v12 }
 0x170   :  { %v289_v13 = vpop.eup %288 }
 0x171   :  { %v205_v14 = vsel %vm132_vm1, %v289_v13, 0.0  ;;  %v291_v15 = vpop.eup %290 }
 0x172   :  { %206 = vadd.xlane.f32.xlu0 %v205_v14  ;;  %v211_v17 = vsel %vm132_vm1, %v291_v15, 0.0 }
 0x174   :  { %v293_v16 = vpop.eup %292 }
 0x175   :  { %v208_v18 = vsel %vm132_vm1, %v293_v16, 0.0  ;;  %v295_v19 = vpop.eup %294 }
 0x176   :  { %212 = vadd.xlane.f32.xlu0 %v211_v17  ;;  %209 = vadd.xlane.f32.xlu1 %v208_v18  ;;  %v214_v20 = vsel %vm132_vm1, %v295_v19, 0.0 }
 0x17a   :  { %215 = vadd.xlane.f32.xlu1 %v214_v20 }
 0x1fb   :  { %v207_v21 = vpop.xlane.xlu0 %206 }
 0x1fc   :  { %296 = vrcp.f32 %v207_v21 }
 0x1ff   :  { %v210_v22 = vpop.xlane.xlu1 %209  ;;  %v213_v23 = vpop.xlane.xlu0 %212 }
 0x200   :  { %298 = vrcp.f32 %v210_v22 }
 0x201   :  { %300 = vrcp.f32 %v213_v23 }
 0x203   :  { %v216_v24 = vpop.xlane.xlu1 %215 }
 0x204   :  { %302 = vrcp.f32 %v216_v24 }
 0x209   :  { %v297_v25 = vpop.eup %296 }
 0x20a   :  { %v221_v26 = vmul.f32 %v297_v25, %v289_v13 }
 0x20c   :  { %225 = vst.msk [vmem:[%s418_s5] sm:$0xff] %vm132_vm1, %v221_v26 }
 0x20d   :  { %v299_v27 = vpop.eup %298 }
 0x20e   :  { %v301_v28 = vpop.eup %300  ;;  %v222_v29 = vmul.f32 %v299_v27, %v293_v16 }
 0x20f   :  { %v223_v30 = vmul.f32 %v301_v28, %v291_v15 }
 0x210   :  { %226 = vst.msk [vmem:[%s418_s5 + $0x8] sm:$0xff] %vm132_vm1, %v222_v29 }
 0x211   :  { %v303_v31 = vpop.eup %302  ;;  %227 = vst.msk [vmem:[%s418_s5 + $0x10] sm:$0xff] %vm132_vm1, %v223_v30 }
 0x212   :  { %v224_v32 = vmul.f32 %v303_v31, %v295_v19 }
 0x214   :  { %228 = vst.msk [vmem:[%s418_s5 + $0x18] sm:$0xff] %vm132_vm1, %v224_v32 }

// kernel: model_v2_forward.9
= control target key start
LH: loop header
LB: loop body
LE: loop exit
PB: predicated region body
PF: predicated region fallthrough
CT: control target
= control target key end

     0   :  { %v231_v0 = vmov 0   ;;  %vm116_vm0 = vcmask 130048   ;;  %vm172_vm1 = vcmask 261120   ;;  %s306_s1 = inlined_call_operand.vmem [shape: bf16[144,32], index: 1, kind: input, shape index: {}]   ;;  %s307_s0 = inlined_call_operand.vmem [shape: bf16[32,144], index: 0, kind: input, shape index: {}]   ;;  %s308_s2 = inlined_call_operand.vmem [shape: f32[1,32], index: 2, kind: input, shape index: {}]   ;;  %s309_s3 = inlined_call_operand.vmem [shape: f32[32,32], index: 3, kind: output, shape index: {}]  }
   0x1   :  { %123 = vmatprep.subr.bf16.mxu0 %v231_v0  ;;  %197 = vmatprep.subr.bf16.mxu1 %v231_v0  ;;  %v216_v1 = vld [vmem:[%s306_s1 + $0x38] sm:$0xff]   ;;  %v217_v2 = vld [vmem:[%s306_s1 + $0x30] sm:$0xff]   ;;  %v218_v3 = vld [vmem:[%s306_s1 + $0x28] sm:$0xff]  }
   0x2   :  { %124 = vmatpush1.bf16.msra.mxu0 %v216_v1  ;;  %206 = vmatpush1.bf16.msra.mxu1 %v216_v1  ;;  %v219_v4 = vld [vmem:[%s306_s1 + $0x20] sm:$0xff]   ;;  %v230_v6 = vld [vmem:[%s307_s0 + $0x14] ss:$8 sps:$4 sm:$0xff]   ;;  %v222_v9 = vld [vmem:[%s306_s1 + $0x8] sm:$0xff]  }
   0x3   :  { %125 = vmatprep.subr.bf16.mxu0 %v231_v0  ;;  %198 = vmatprep.subr.bf16.mxu1 %v231_v0  ;;  %v227_v5 = vld [vmem:[%s307_s0 + $0x4] ss:$8 sps:$4 sm:$0xff]   ;;  %v220_v7 = vld [vmem:[%s306_s1 + $0x18] sm:$0xff]   ;;  %v221_v8 = vld [vmem:[%s306_s1 + $0x10] sm:$0xff]  }
   0x4   :  { %195 = vmatprep.mubr.msk.bf16.mxu0 %vm116_vm0, %v227_v5  ;;  %196 = vmatprep.mubr.msk.bf16.mxu1 %vm116_vm0, %v230_v6  ;;  %v223_v10 = vld [vmem:[%s306_s1] sm:$0xff]   ;;  %v228_v13 = vld [vmem:[%s307_s0 + $0x10] ss:$8 sps:$4 sm:$0xff]  }
   0x5   :  { %v224_v11 = vld [vmem:[%s306_s1 + $0x40] sm:$0xff]  }
   0x6   :  { %126 = vmatpush1.bf16.msra.mxu0 %v217_v2  ;;  %207 = vmatpush1.bf16.msra.mxu1 %v217_v2  ;;  %v225_v12 = vld [vmem:[%s307_s0] ss:$8 sps:$4 sm:$0xff]  }
   0x7   :  { %127 = vmatprep.subr.bf16.mxu0 %v231_v0  ;;  %199 = vmatprep.subr.bf16.mxu1 %v231_v0  ;;  %v181_v14 = vld [vmem:[%s308_s2] ss:$0 sm:$0xff] }
   0xa   :  { %128 = vmatpush1.bf16.msra.mxu0 %v218_v3  ;;  %208 = vmatpush1.bf16.msra.mxu1 %v218_v3 }
   0xb   :  { %129 = vmatprep.subr.bf16.mxu0 %v231_v0  ;;  %200 = vmatprep.subr.bf16.mxu1 %v231_v0 }
   0xe   :  { %130 = vmatpush1.bf16.msra.mxu0 %v219_v4  ;;  %209 = vmatpush1.bf16.msra.mxu1 %v219_v4 }
   0xf   :  { %131 = vmatprep.subr.bf16.mxu0 %v231_v0  ;;  %201 = vmatprep.subr.bf16.mxu1 %v231_v0 }
  0x12   :  { %132 = vmatpush1.bf16.msra.mxu0 %v220_v7  ;;  %210 = vmatpush1.bf16.msra.mxu1 %v220_v7 }
  0x13   :  { %133 = vmatprep.subr.bf16.mxu0 %v231_v0  ;;  %202 = vmatprep.subr.bf16.mxu1 %v231_v0 }
  0x16   :  { %134 = vmatpush1.bf16.msra.mxu0 %v221_v8  ;;  %211 = vmatpush1.bf16.msra.mxu1 %v221_v8 }
  0x17   :  { %135 = vmatprep.subr.bf16.mxu0 %v231_v0  ;;  %203 = vmatprep.subr.bf16.mxu1 %v231_v0 }
  0x1a   :  { %136 = vmatpush1.bf16.msra.mxu0 %v222_v9  ;;  %212 = vmatpush1.bf16.msra.mxu1 %v222_v9 }
  0x1b   :  { %137 = vmatprep.subr.bf16.mxu0 %v231_v0  ;;  %204 = vmatprep.subr.bf16.mxu1 %v231_v0 }
  0x1e   :  { %138 = vmatpush1.bf16.msra.mxu0 %v223_v10  ;;  %213 = vmatpush1.bf16.msra.mxu1 %v223_v10 }
  0x1f   :  { %153 = vmatprep.subr.bf16.mxu0 %v231_v0  ;;  %205 = vmatprep.subr.bf16.mxu1 %v231_v0 }
  0x22   :  { %154 = vmatpush2.bf16.msra.mxu0 %v224_v11  ;;  %214 = vmatpush2.bf16.msra.mxu1 %v224_v11 }
  0x25   :  { %156 = vmatmul.mubr.bf16.vlgmr.msra.gmra.mxu0 %v225_v12  ;;  %164 = vmatmul.mubr.bf16.vlgmr.msra.gmra.mxu1 %v228_v13 }
  0xe5   :  { %v157_v15 = vpop.f32.mrf.mxu0  ;;  %v165_v16 = vpop.f32.mrf.mxu1 }
  0xe6   :  { %v158_v17 = vadd.f32 %v181_v14, %v157_v15  ;;  %v166_v18 = vadd.f32 %v181_v14, %v165_v16 }
  0xe7   :  { %v159_v19 = vpop.f32.mrf.mxu0  ;;  %v167_v20 = vpop.f32.mrf.mxu1 }
  0xe8   :  { %173 = vst.msk [vmem:[%s309_s3] sm:$0xff] %vm172_vm1, %v158_v17  ;;  %175 = vst.msk [vmem:[%s309_s3 + $0x10] sm:$0xff] %vm172_vm1, %v166_v18 }
  0xe9   :  { %v160_v21 = vpop.f32.mrf.mxu0  ;;  %v168_v22 = vpop.f32.mrf.mxu1 }
  0xea   :  { %v161_v23 = vadd.f32 %v181_v14, %v160_v21  ;;  %v169_v24 = vadd.f32 %v181_v14, %v168_v22 }
  0xeb   :  { %v162_v25 = vpop.f32.mrf.mxu0  ;;  %v170_v26 = vpop.f32.mrf.mxu1 }
  0xec   :  { %174 = vst.msk [vmem:[%s309_s3 + $0x8] sm:$0xff] %vm172_vm1, %v161_v23  ;;  %176 = vst.msk [vmem:[%s309_s3 + $0x18] sm:$0xff] %vm172_vm1, %v169_v24 }

// kernel: model_v2_forward.10
= control target key start
LH: loop header
LB: loop body
LE: loop exit
PB: predicated region body
PF: predicated region fallthrough
CT: control target
= control target key end

     0   :  { %vm204_vm0 = vcmask 261120   ;;  %s521_s1 = inlined_call_operand.vmem [shape: bf16[288,128], index: 1, kind: input, shape index: {}]   ;;  %s522_s0 = inlined_call_operand.vmem [shape: bf16[32,288], index: 0, kind: input, shape index: {}]   ;;  %s523_s2 = inlined_call_operand.vmem [shape: f32[1,128], index: 2, kind: input, shape index: {}]   ;;  %s524_s3 = inlined_call_operand.vmem [shape: f32[32,128], index: 3, kind: output, shape index: {}]  }
   0x1   :  { %v388_v0 = vld [vmem:[%s521_s1 + $0x78] sm:$0xff]   ;;  %v390_v2 = vld [vmem:[%s521_s1 + $0x70] sm:$0xff]   ;;  %v392_v4 = vld [vmem:[%s521_s1 + $0x68] sm:$0xff]  }
   0x2   :  { %v389_v1 = vld [vmem:[%s521_s1 + $0x38] sm:$0xff]   ;;  %348 = vmatprep.subr.bf16.mxu0 %v388_v0  ;;  %v391_v3 = vld [vmem:[%s521_s1 + $0x30] sm:$0xff]   ;;  %v393_v5 = vld [vmem:[%s521_s1 + $0x28] sm:$0xff]  }
   0x3   :  { %349 = vmatpush3.bf16.msra.mxu0 %v389_v1  ;;  %v394_v6 = vld [vmem:[%s521_s1 + $0x60] sm:$0xff]   ;;  %v396_v8 = vld [vmem:[%s521_s1 + $0x58] sm:$0xff]   ;;  %v403_v10 = vld [vmem:[%s521_s1 + $0x88] sm:$0xff]  }
   0x4   :  { %350 = vmatprep.subr.bf16.mxu0 %v390_v2  ;;  %v395_v7 = vld [vmem:[%s521_s1 + $0x20] sm:$0xff]   ;;  %v397_v9 = vld [vmem:[%s521_s1 + $0x18] sm:$0xff]   ;;  %v398_v11 = vld [vmem:[%s521_s1 + $0x50] sm:$0xff]   ;;  %380 = vmatprep.subr.bf16.mxu1 %v403_v10 }
   0x5   :  { %v399_v12 = vld [vmem:[%s521_s1 + $0x10] sm:$0xff]   ;;  %v400_v13 = vld [vmem:[%s521_s1 + $0x48] sm:$0xff]   ;;  %381 = vmatpush3.bf16.msra.mxu1 %v403_v10  ;;  %v408_v15 = vld [vmem:[%s521_s1 + $0x80] sm:$0xff]  }
   0x6   :  { %v407_v14 = vld [vmem:[%s522_s0 + $0x4] ss:$12 sps:$4 sm:$0xff]   ;;  %v409_v16 = vld [vmem:[%s522_s0 + $0x8] ss:$12 sps:$4 sm:$0xff]   ;;  %382 = vmatprep.subr.bf16.mxu1 %v408_v15  ;;  %v410_v17 = vld [vmem:[%s522_s0 + $0x20] ss:$12 sps:$4 sm:$0xff]  }
   0x7   :  { %351 = vmatpush3.bf16.msra.mxu0 %v391_v3  ;;  %243 = vmatprep.mubr.bf16.mxu0 %v407_v14  ;;  %v401_v18 = vld [vmem:[%s521_s1 + $0x8] sm:$0xff]   ;;  %v402_v19 = vld [vmem:[%s521_s1 + $0x40] sm:$0xff]  }
   0x8   :  { %352 = vmatprep.subr.bf16.mxu0 %v392_v4  ;;  %384 = vmatprep.mubr.msk.bf16.mxu1 %vm204_vm0, %v409_v16  ;;  %v404_v20 = vld [vmem:[%s521_s1] sm:$0xff]   ;;  %v411_v22 = vld [vmem:[%s522_s0 + $0x1c] ss:$12 sps:$4 sm:$0xff]  }
   0x9   :  { %383 = vmatpush3.bf16.msra.mxu1 %v408_v15  ;;  %v405_v21 = vld [vmem:[%s522_s0] ss:$12 sps:$4 sm:$0xff]   ;;  %v413_v23 = vld [vmem:[%s522_s0 + $0x18] ss:$12 sps:$4 sm:$0xff]  }
   0xa   :  { %v321_v28 = vld [vmem:[%s523_s2] ss:$0 sm:$0xff] }
   0xb   :  { %353 = vmatpush3.bf16.msra.mxu0 %v393_v5 }
   0xc   :  { %354 = vmatprep.subr.bf16.mxu0 %v394_v6  ;;  %385 = vmatmul.mubr.msk.bf16.vlgmr.msra.gmra.mxu1 %vm204_vm0, %v410_v17 }
   0xf   :  { %355 = vmatpush3.bf16.msra.mxu0 %v395_v7 }
  0x10   :  { %356 = vmatprep.subr.bf16.mxu0 %v396_v8 }
  0x13   :  { %357 = vmatpush3.bf16.msra.mxu0 %v397_v9 }
  0x14   :  { %358 = vmatprep.subr.bf16.mxu0 %v398_v11 }
  0x17   :  { %359 = vmatpush3.bf16.msra.mxu0 %v399_v12 }
  0x18   :  { %360 = vmatprep.subr.bf16.mxu0 %v400_v13 }
  0x1b   :  { %361 = vmatpush3.bf16.msra.mxu0 %v401_v18 }
  0x1c   :  { %362 = vmatprep.subr.bf16.mxu0 %v402_v19 }
  0x1f   :  { %363 = vmatpush3.bf16.msra.mxu0 %v404_v20 }
  0x22   :  { %244 = vmatmul.mubr.bf16.vlgmr.msra.gmra.mxu0 %v405_v21 }
  0x23   :  { %251 = vmatprep.mubr.bf16.mxu0 %v411_v22 }
  0x2a   :  { %252 = vmatmul.mubr.bf16.gmra.mxu0 %v413_v23 }
  0xcc   :  { %v386_v24 = vpop.f32.mrf.mxu1 }
  0xce   :  { %v294_v26 = vpop.f32.mrf.mxu1 }
  0xd0   :  { %v387_v31 = vpop.f32.mrf.mxu1 }
  0xd2   :  { %v297_v37 = vpop.f32.mrf.mxu1 }
  0xe2   :  { %v364_v25 = vpop.f32.mrf.mxu0 }
  0xe4   :  { %v365_v27 = vpop.f32.mrf.mxu0 }
  0xe5   :  { %v366_v29 = vadd.f32 %v365_v27, %v364_v25 }
  0xe6   :  { %v367_v30 = vpop.f32.mrf.mxu0 }
  0xe7   :  { %v246_v32 = vadd.f32 %v366_v29, %v321_v28 }
  0xe8   :  { %v368_v33 = vpop.f32.mrf.mxu0 }
  0xe9   :  { %v369_v34 = vadd.f32 %v368_v33, %v367_v30  ;;  %v295_v35 = vadd.f32 %v294_v26, %v246_v32 }
  0xea   :  { %v370_v36 = vpop.f32.mrf.mxu0 }
  0xeb   :  { %v309_v38 = vmax.f32 %v295_v35, 0.0  ;;  %v249_v39 = vadd.f32 %v369_v34, %v321_v28 }
  0xec   :  { %v371_v40 = vpop.f32.mrf.mxu0 }
  0xed   :  { %313 = vst [vmem:[%s524_s3] sm:$0xff] %v309_v38  ;;  %v372_v41 = vadd.f32 %v371_v40, %v370_v36  ;;  %v298_v42 = vadd.f32 %v297_v37, %v249_v39 }
  0xee   :  { %v373_v43 = vpop.f32.mrf.mxu0 }
  0xef   :  { %v254_v44 = vadd.f32 %v372_v41, %v321_v28  ;;  %v310_v45 = vmax.f32 %v298_v42, 0.0 }
  0xf0   :  { %v374_v46 = vpop.f32.mrf.mxu0 }
  0xf1   :  { %v303_v47 = vadd.f32 %v386_v24, %v254_v44  ;;  %314 = vst [vmem:[%s524_s3 + $0x8] sm:$0xff] %v310_v45  ;;  %v375_v48 = vadd.f32 %v374_v46, %v373_v43 }
  0xf3   :  { %v311_v49 = vmax.f32 %v303_v47, 0.0  ;;  %v257_v50 = vadd.f32 %v375_v48, %v321_v28 }
  0xf5   :  { %315 = vst [vmem:[%s524_s3 + $0x10] sm:$0xff] %v311_v49  ;;  %v306_v51 = vadd.f32 %v387_v31, %v257_v50 }
  0xf7   :  { %v312_v52 = vmax.f32 %v306_v51, 0.0 }
  0xf9   :  { %316 = vst [vmem:[%s524_s3 + $0x18] sm:$0xff] %v312_v52 }

// kernel: model_v2_forward.11
= control target key start
LH: loop header
LB: loop body
LE: loop exit
PB: predicated region body
PF: predicated region fallthrough
CT: control target
= control target key end

     0   :  { %vm318_vm0 = vcmask 261120   ;;  %vm537_vm1 = vcmask 97280   ;;  %s1023_s1 = inlined_call_operand.vmem [shape: bf16[288,12], index: 1, kind: input, shape index: {}]   ;;  %s1024_s0 = inlined_call_operand.vmem [shape: bf16[128,288], index: 0, kind: input, shape index: {}]   ;;  %s1025_s2 = inlined_call_operand.vmem [shape: f32[1,12], index: 2, kind: input, shape index: {}]   ;;  %s1026_s3 = inlined_call_operand.vmem [shape: f32[128,12], index: 3, kind: output, shape index: {}]  }
   0x1   :  { %v719_v0 = vld [vmem:[%s1023_s1 + $0x78] sm:$0xff]   ;;  %v721_v2 = vld [vmem:[%s1023_s1 + $0x70] sm:$0xff]   ;;  %v723_v4 = vld [vmem:[%s1023_s1 + $0x68] sm:$0xff]  }
   0x2   :  { %v720_v1 = vld [vmem:[%s1023_s1 + $0x38] sm:$0xff]   ;;  %609 = vmatprep.subr.bf16.mxu0 %v719_v0  ;;  %703 = vmatprep.subr.bf16.mxu1 %v719_v0  ;;  %v722_v3 = vld [vmem:[%s1023_s1 + $0x30] sm:$0xff]   ;;  %v724_v5 = vld [vmem:[%s1023_s1 + $0x28] sm:$0xff]  }
   0x3   :  { %610 = vmatpush3.bf16.msra.mxu0 %v720_v1  ;;  %711 = vmatpush3.bf16.msra.mxu1 %v720_v1  ;;  %v725_v6 = vld [vmem:[%s1023_s1 + $0x60] sm:$0xff]   ;;  %v727_v8 = vld [vmem:[%s1023_s1 + $0x58] sm:$0xff]   ;;  %v729_v10 = vld [vmem:[%s1023_s1 + $0x50] sm:$0xff]  }
   0x4   :  { %611 = vmatprep.subr.bf16.mxu0 %v721_v2  ;;  %704 = vmatprep.subr.bf16.mxu1 %v721_v2  ;;  %v726_v7 = vld [vmem:[%s1023_s1 + $0x20] sm:$0xff]   ;;  %v728_v9 = vld [vmem:[%s1023_s1 + $0x18] sm:$0xff]   ;;  %v730_v13 = vld [vmem:[%s1023_s1 + $0x10] sm:$0xff]  }
   0x5   :  { %v737_v11 = vld [vmem:[%s1024_s0 + $0x4] ss:$12 sps:$4 sm:$0xff]   ;;  %v740_v12 = vld [vmem:[%s1024_s0 + $0x94] ss:$12 sps:$4 sm:$0xff]   ;;  %v731_v14 = vld [vmem:[%s1023_s1 + $0x48] sm:$0xff]  }
   0x6   :  { %375 = vmatprep.mubr.bf16.mxu0 %v737_v11  ;;  %423 = vmatprep.mubr.bf16.mxu1 %v740_v12  ;;  %v732_v15 = vld [vmem:[%s1023_s1 + $0x8] sm:$0xff]   ;;  %v733_v16 = vld [vmem:[%s1023_s1 + $0x40] sm:$0xff]   ;;  %v738_v20 = vld [vmem:[%s1024_s0 + $0x90] ss:$12 sps:$4 sm:$0xff]  }
   0x7   :  { %612 = vmatpush3.bf16.msra.mxu0 %v722_v3  ;;  %712 = vmatpush3.bf16.msra.mxu1 %v722_v3  ;;  %v734_v17 = vld [vmem:[%s1023_s1] sm:$0xff]   ;;  %v741_v19 = vld [vmem:[%s1023_s1 + $0x88] sm:$0xff]   ;;  %v752_v28 = vld [vmem:[%s1024_s0 + $0x30] ss:$12 sps:$4 sm:$0xff]  }
   0x8   :  { %613 = vmatprep.subr.bf16.mxu0 %v723_v4  ;;  %705 = vmatprep.subr.bf16.mxu1 %v723_v4  ;;  %v735_v18 = vld [vmem:[%s1024_s0] ss:$12 sps:$4 sm:$0xff]   ;;  %v742_v21 = vld [vmem:[%s1024_s0 + $0x1c] ss:$12 sps:$4 sm:$0xff]   ;;  %v746_v24 = vld [vmem:[%s1024_s0 + $0x18] ss:$12 sps:$4 sm:$0xff]  }
   0x9   :  { %v744_v22 = vld [vmem:[%s1024_s0 + $0xac] ss:$12 sps:$4 sm:$0xff]   ;;  %v748_v23 = vld [vmem:[%s1023_s1 + $0x80] sm:$0xff]   ;;  %v747_v25 = vld [vmem:[%s1024_s0 + $0xa8] ss:$12 sps:$4 sm:$0xff]  }
   0xa   :  { %v749_v26 = vld [vmem:[%s1024_s0 + $0x34] ss:$12 sps:$4 sm:$0xff]   ;;  %v754_v30 = vld [vmem:[%s1024_s0 + $0x4c] ss:$12 sps:$4 sm:$0xff]   ;;  %v758_v33 = vld [vmem:[%s1024_s0 + $0x50] ss:$12 sps:$4 sm:$0xff]  }
   0xb   :  { %614 = vmatpush3.bf16.msra.mxu0 %v724_v5  ;;  %713 = vmatpush3.bf16.msra.mxu1 %v724_v5  ;;  %v751_v27 = vld [vmem:[%s1024_s0 + $0x8] ss:$12 sps:$4 sm:$0xff]   ;;  %v753_v29 = vld [vmem:[%s1024_s0 + $0x20] ss:$12 sps:$4 sm:$0xff]   ;;  %v756_v31 = vld [vmem:[%s1024_s0 + $0x38] ss:$12 sps:$4 sm:$0xff]  }
   0xc   :  { %615 = vmatprep.subr.bf16.mxu0 %v725_v6  ;;  %706 = vmatprep.subr.bf16.mxu1 %v725_v6  ;;  %v757_v32 = vld [vmem:[%s1024_s0 + $0x48] ss:$12 sps:$4 sm:$0xff]   ;;  %v759_v34 = vld [vmem:[%s1024_s0 + $0x64] ss:$12 sps:$4 sm:$0xff]   ;;  %v762_v36 = vld [vmem:[%s1024_s0 + $0x60] ss:$12 sps:$4 sm:$0xff]  }
   0xd   :  { %v761_v35 = vld [vmem:[%s1024_s0 + $0x68] ss:$12 sps:$4 sm:$0xff]   ;;  %v763_v37 = vld [vmem:[%s1024_s0 + $0x80] ss:$12 sps:$4 sm:$0xff]   ;;  %v766_v39 = vld [vmem:[%s1024_s0 + $0x98] ss:$12 sps:$4 sm:$0xff]  }
   0xe   :  { %v764_v38 = vld [vmem:[%s1024_s0 + $0x7c] ss:$12 sps:$4 sm:$0xff]   ;;  %v767_v40 = vld [vmem:[%s1024_s0 + $0x78] ss:$12 sps:$4 sm:$0xff]   ;;  %v936_v60 = vld [vmem:[%s1025_s2] ss:$0 sm:$0xff] }
   0xf   :  { %616 = vmatpush3.bf16.msra.mxu0 %v726_v7  ;;  %714 = vmatpush3.bf16.msra.mxu1 %v726_v7  ;;  %v768_v41 = vld [vmem:[%s1024_s0 + $0xb0] ss:$12 sps:$4 sm:$0xff]  }
  0x10   :  { %617 = vmatprep.subr.bf16.mxu0 %v727_v8  ;;  %707 = vmatprep.subr.bf16.mxu1 %v727_v8 }
  0x13   :  { %618 = vmatpush3.bf16.msra.mxu0 %v728_v9  ;;  %715 = vmatpush3.bf16.msra.mxu1 %v728_v9 }
  0x14   :  { %619 = vmatprep.subr.bf16.mxu0 %v729_v10  ;;  %708 = vmatprep.subr.bf16.mxu1 %v729_v10 }
  0x17   :  { %620 = vmatpush3.bf16.msra.mxu0 %v730_v13  ;;  %716 = vmatpush3.bf16.msra.mxu1 %v730_v13 }
  0x18   :  { %621 = vmatprep.subr.bf16.mxu0 %v731_v14  ;;  %709 = vmatprep.subr.bf16.mxu1 %v731_v14 }
  0x1b   :  { %622 = vmatpush3.bf16.msra.mxu0 %v732_v15  ;;  %717 = vmatpush3.bf16.msra.mxu1 %v732_v15 }
  0x1c   :  { %623 = vmatprep.subr.bf16.mxu0 %v733_v16  ;;  %710 = vmatprep.subr.bf16.mxu1 %v733_v16 }
  0x1f   :  { %624 = vmatpush3.bf16.msra.mxu0 %v734_v17  ;;  %718 = vmatpush3.bf16.msra.mxu1 %v734_v17 }
  0x20   :  { %683 = vmatprep.subr.bf16.mxu1 %v741_v19 }
  0x22   :  { %376 = vmatmul.mubr.bf16.vlgmr.msra.gmra.mxu0 %v735_v18  ;;  %424 = vmatmul.mubr.bf16.vlgmr.msra.gmra.mxu1 %v738_v20 }
  0x23   :  { %684 = vmatpush3.bf16.msra.mxu1 %v741_v19  ;;  %383 = vmatprep.mubr.bf16.mxu0 %v742_v21 }
  0x24   :  { %431 = vmatprep.mubr.bf16.mxu1 %v744_v22  ;;  %685 = vmatprep.subr.bf16.mxu1 %v748_v23 }
  0x27   :  { %686 = vmatpush3.bf16.msra.mxu1 %v748_v23 }
  0x2a   :  { %384 = vmatmul.mubr.bf16.gmra.mxu0 %v746_v24  ;;  %432 = vmatmul.mubr.bf16.gmra.mxu1 %v747_v25 }
  0x2b   :  { %391 = vmatprep.mubr.bf16.mxu0 %v749_v26  ;;  %687 = vmatprep.mubr.msk.bf16.mxu1 %vm318_vm0, %v751_v27 }
  0x32   :  { %392 = vmatmul.mubr.bf16.gmra.mxu0 %v752_v28  ;;  %688 = vmatmul.mubr.msk.bf16.vlgmr.msra.gmra.mxu1 %vm318_vm0, %v753_v29 }
  0x33   :  { %399 = vmatprep.mubr.bf16.mxu0 %v754_v30  ;;  %691 = vmatprep.mubr.msk.bf16.mxu1 %vm318_vm0, %v756_v31 }
  0x3a   :  { %400 = vmatmul.mubr.bf16.gmra.mxu0 %v757_v32  ;;  %692 = vmatmul.mubr.msk.bf16.gmra.mxu1 %vm318_vm0, %v758_v33 }
  0x3b   :  { %407 = vmatprep.mubr.bf16.mxu0 %v759_v34  ;;  %695 = vmatprep.mubr.msk.bf16.mxu1 %vm318_vm0, %v761_v35 }
  0x42   :  { %408 = vmatmul.mubr.bf16.gmra.mxu0 %v762_v36  ;;  %696 = vmatmul.mubr.msk.bf16.gmra.mxu1 %vm318_vm0, %v763_v37 }
  0x43   :  { %415 = vmatprep.mubr.bf16.mxu0 %v764_v38  ;;  %699 = vmatprep.mubr.msk.bf16.mxu1 %vm318_vm0, %v766_v39 }
  0x4a   :  { %416 = vmatmul.mubr.bf16.gmra.mxu0 %v767_v40  ;;  %700 = vmatmul.mubr.msk.bf16.gmra.mxu1 %vm318_vm0, %v768_v41 }
  0xe2   :  { %v625_v42 = vpop.f32.mrf.mxu0  ;;  %v923_v43 = vpop.f32.mrf.mxu1 }
  0xe4   :  { %v626_v44 = vpop.f32.mrf.mxu0  ;;  %v925_v45 = vpop.f32.mrf.mxu1 }
  0xe5   :  { %v627_v57 = vadd.f32 %v626_v44, %v625_v42  ;;  %v663_v44 = vadd.f32 %v925_v45, %v923_v43 }
  0xe6   :  { %v628_v46 = vpop.f32.mrf.mxu0  ;;  %v927_v47 = vpop.f32.mrf.mxu1 }
  0xe7   :  { %v378_v3 = vadd.f32 %v627_v57, %v936_v60 }
  0xe8   :  { %v629_v48 = vpop.f32.mrf.mxu0  ;;  %v929_v49 = vpop.f32.mrf.mxu1 }
  0xe9   :  { %v630_v1 = vadd.f32 %v629_v48, %v628_v46  ;;  %v666_v43 = vadd.f32 %v929_v49, %v927_v47 }
  0xea   :  { %v631_v50 = vpop.f32.mrf.mxu0  ;;  %v667_v51 = vpop.f32.mrf.mxu1 }
  0xeb   :  { %v381_v12 = vadd.f32 %v630_v1, %v936_v60 }
  0xec   :  { %v632_v52 = vpop.f32.mrf.mxu0  ;;  %v668_v53 = vpop.f32.mrf.mxu1 }
  0xed   :  { %v633_v54 = vadd.f32 %v632_v52, %v631_v50  ;;  %v669_v38 = vadd.f32 %v668_v53, %v667_v51 }
  0xee   :  { %v634_v55 = vpop.f32.mrf.mxu0  ;;  %v931_v56 = vpop.f32.mrf.mxu1 }
  0xef   :  { %v386_v62 = vadd.f32 %v633_v54, %v936_v60  ;;  %v434_v53 = vadd.f32 %v669_v38, %v936_v60 }
  0xf0   :  { %v635_v58 = vpop.f32.mrf.mxu0  ;;  %v671_v59 = vpop.f32.mrf.mxu1 }
  0xf1   :  { %v636_v61 = vadd.f32 %v635_v58, %v634_v55  ;;  %v672_v52 = vadd.f32 %v671_v59, %v931_v56 }
  0xf2   :  { %v637_v63 = vpop.f32.mrf.mxu0  ;;  %v689_v0 = vpop.f32.mrf.mxu1 }
  0xf3   :  { %v483_v2 = vadd.f32 %v689_v0, %v386_v62  ;;  %v389_v7 = vadd.f32 %v636_v61, %v936_v60  ;;  %v426_v61 = vadd.f32 %v663_v44, %v936_v60  ;;  %v437_v49 = vadd.f32 %v672_v52, %v936_v60 }
  0xf4   :  { %v638_v4 = vpop.f32.mrf.mxu0  ;;  %v474_v5 = vpop.f32.mrf.mxu1 }
  0xf5   :  { %540 = vst.msk [vmem:[%s1026_s3 + $0x10] sm:$0xff] %vm537_vm1, %v483_v2  ;;  %v475_v6 = vadd.f32 %v474_v5, %v378_v3  ;;  %v639_v10 = vadd.f32 %v638_v4, %v637_v63  ;;  %v429_v4 = vadd.f32 %v666_v43, %v936_v60 }
  0xf6   :  { %v640_v8 = vpop.f32.mrf.mxu0  ;;  %v690_v9 = vpop.f32.mrf.mxu1 }
  0xf7   :  { %538 = vst.msk [vmem:[%s1026_s3] sm:$0xff] %vm537_vm1, %v475_v6  ;;  %v486_v11 = vadd.f32 %v690_v9, %v389_v7  ;;  %v394_v19 = vadd.f32 %v639_v10, %v936_v60 }
  0xf8   :  { %v641_v13 = vpop.f32.mrf.mxu0  ;;  %v477_v14 = vpop.f32.mrf.mxu1 }
  0xf9   :  { %541 = vst.msk [vmem:[%s1026_s3 + $0x18] sm:$0xff] %vm537_vm1, %v486_v11  ;;  %v478_v15 = vadd.f32 %v477_v14, %v381_v12  ;;  %v642_v18 = vadd.f32 %v641_v13, %v640_v8 }
  0xfa   :  { %v643_v16 = vpop.f32.mrf.mxu0  ;;  %v693_v17 = vpop.f32.mrf.mxu1 }
  0xfb   :  { %539 = vst.msk [vmem:[%s1026_s3 + $0x8] sm:$0xff] %vm537_vm1, %v478_v15  ;;  %v397_v27 = vadd.f32 %v642_v18, %v936_v60 }
  0xfc   :  { %v644_v20 = vpop.f32.mrf.mxu0  ;;  %v490_v21 = vpop.f32.mrf.mxu1 }
  0xfd   :  { %v645_v22 = vadd.f32 %v644_v20, %v643_v16  ;;  %v491_v23 = vadd.f32 %v490_v21, %v394_v19 }
  0xfe   :  { %v646_v24 = vpop.f32.mrf.mxu0  ;;  %v694_v25 = vpop.f32.mrf.mxu1 }
  0xff   :  { %v402_v26 = vadd.f32 %v645_v22, %v936_v60  ;;  %542 = vst.msk [vmem:[%s1026_s3 + $0x20] sm:$0xff] %vm537_vm1, %v491_v23 }
 0x100   :  { %v647_v28 = vpop.f32.mrf.mxu0  ;;  %v493_v29 = vpop.f32.mrf.mxu1 }
 0x101   :  { %v499_v30 = vadd.f32 %v693_v17, %v402_v26  ;;  %v648_v31 = vadd.f32 %v647_v28, %v646_v24  ;;  %v494_v32 = vadd.f32 %v493_v29, %v397_v27 }
 0x102   :  { %v649_v33 = vpop.f32.mrf.mxu0  ;;  %v697_v34 = vpop.f32.mrf.mxu1 }
 0x103   :  { %544 = vst.msk [vmem:[%s1026_s3 + $0x30] sm:$0xff] %vm537_vm1, %v499_v30  ;;  %v405_v35 = vadd.f32 %v648_v31, %v936_v60  ;;  %543 = vst.msk [vmem:[%s1026_s3 + $0x28] sm:$0xff] %vm537_vm1, %v494_v32 }
 0x104   :  { %v650_v36 = vpop.f32.mrf.mxu0  ;;  %v506_v37 = vpop.f32.mrf.mxu1 }
 0x105   :  { %v502_v39 = vadd.f32 %v694_v25, %v405_v35  ;;  %v651_v40 = vadd.f32 %v650_v36, %v649_v33 }
 0x106   :  { %v652_v41 = vpop.f32.mrf.mxu0  ;;  %v698_v42 = vpop.f32.mrf.mxu1 }
 0x107   :  { %545 = vst.msk [vmem:[%s1026_s3 + $0x38] sm:$0xff] %vm537_vm1, %v502_v39  ;;  %v410_v46 = vadd.f32 %v651_v40, %v936_v60 }
 0x108   :  { %v653_v48 = vpop.f32.mrf.mxu0  ;;  %v509_v50 = vpop.f32.mrf.mxu1 }
 0x109   :  { %v507_v54 = vadd.f32 %v506_v37, %v410_v46  ;;  %v654_v51 = vadd.f32 %v653_v48, %v652_v41 }
 0x10a   :  { %v655_v55 = vpop.f32.mrf.mxu0  ;;  %v701_v57 = vpop.f32.mrf.mxu1 }
 0x10b   :  { %546 = vst.msk [vmem:[%s1026_s3 + $0x40] sm:$0xff] %vm537_vm1, %v507_v54  ;;  %v413_v45 = vadd.f32 %v654_v51, %v936_v60  ;;  %v531_v58 = vadd.f32 %v701_v57, %v434_v53 }
 0x10c   :  { %v656_v56 = vpop.f32.mrf.mxu0  ;;  %v522_v59 = vpop.f32.mrf.mxu1 }
 0x10d   :  { %v510_v62 = vadd.f32 %v509_v50, %v413_v45  ;;  %552 = vst.msk [vmem:[%s1026_s3 + $0x70] sm:$0xff] %vm537_vm1, %v531_v58  ;;  %v657_v63 = vadd.f32 %v656_v56, %v655_v55  ;;  %v523_v47 = vadd.f32 %v522_v59, %v426_v61 }
 0x10e   :  { %v658_v0 = vpop.f32.mrf.mxu0  ;;  %v702_v1 = vpop.f32.mrf.mxu1 }
 0x10f   :  { %547 = vst.msk [vmem:[%s1026_s3 + $0x48] sm:$0xff] %vm537_vm1, %v510_v62  ;;  %v418_v2 = vadd.f32 %v657_v63, %v936_v60  ;;  %550 = vst.msk [vmem:[%s1026_s3 + $0x60] sm:$0xff] %vm537_vm1, %v523_v47  ;;  %v534_v3 = vadd.f32 %v702_v1, %v437_v49 }
 0x110   :  { %v659_v5 = vpop.f32.mrf.mxu0  ;;  %v525_v6 = vpop.f32.mrf.mxu1 }
 0x111   :  { %v515_v7 = vadd.f32 %v697_v34, %v418_v2  ;;  %553 = vst.msk [vmem:[%s1026_s3 + $0x78] sm:$0xff] %vm537_vm1, %v534_v3  ;;  %v660_v8 = vadd.f32 %v659_v5, %v658_v0  ;;  %v526_v9 = vadd.f32 %v525_v6, %v429_v4 }
 0x113   :  { %548 = vst.msk [vmem:[%s1026_s3 + $0x50] sm:$0xff] %vm537_vm1, %v515_v7  ;;  %v421_v10 = vadd.f32 %v660_v8, %v936_v60  ;;  %551 = vst.msk [vmem:[%s1026_s3 + $0x68] sm:$0xff] %vm537_vm1, %v526_v9 }
 0x115   :  { %v518_v11 = vadd.f32 %v698_v42, %v421_v10 }
 0x117   :  { %549 = vst.msk [vmem:[%s1026_s3 + $0x58] sm:$0xff] %vm537_vm1, %v518_v11 }

</bundles_post_ra>
